<compile_context>
chip_gen: v7x
topology: tpu7x:2x2x1
jax: 0.10.0
libtpu: 0.0.40
codegen_flags: <defaults>
</compile_context>

<pallas_src>
import math
import functools

import jax
import jax.numpy as jnp
from jax import lax
from jax.experimental import pallas as pl
from jax.experimental.pallas import tpu as pltpu


# ----------------------------------------------------------------------------------------------
# Pallas kernels
# ----------------------------------------------------------------------------------------------

def _dwconv_kernel(*refs, with_skip, with_toimg):
    """Row-tiled modulated depthwise-separable conv + noise + bias + fused leaky relu,
    optionally fused with the encoder skip and the to_img 1x1 conv.

    per grid step (b, r):
      x     (1, TH, W, Cin)   bf16   row band
      top   (1, 1,  W, Cin)   bf16   row r*TH-1 (clamped; zeroed in-kernel at r == 0)
      bot   (1, 1,  W, Cin)   bf16   row r*TH+TH (clamped; zeroed at last tile)
      wf    (1, 3, 3*Cin, Cout) bf16 folded (mod+demod) weight, taps K-packed over dw
      noise (TH, W)           f32
      nw    (1, 1)            f32    SMEM scalar
      bias  (1, Cout)         f32
      [skip (1, TH, W, Cout)  bf16]
      [tw   (1, Cout, Cf) bf16, tb (1, Cf) f32]
      out   (1, TH, W, Cout)
      [freq (1, TH, W, Cf)]
    """
    idx = 0
    x_ref = refs[idx]; idx += 1
    top_ref = refs[idx]; idx += 1
    bot_ref = refs[idx]; idx += 1
    wf_ref = refs[idx]; idx += 1
    noise_ref = refs[idx]; idx += 1
    nw_ref = refs[idx]; idx += 1
    bias_ref = refs[idx]; idx += 1
    skip_ref = None
    if with_skip:
        skip_ref = refs[idx]; idx += 1
    tw_ref = tb_ref = None
    if with_toimg:
        tw_ref = refs[idx]; idx += 1
        tb_ref = refs[idx]; idx += 1
    out_ref = refs[idx]; idx += 1
    freq_ref = refs[idx] if with_toimg else None

    TH, W, Cout = out_ref.shape[1], out_ref.shape[2], out_ref.shape[3]
    Cin = x_ref.shape[3]
    r = pl.program_id(1)
    r_last = pl.num_programs(1) - 1

    # ---- assemble the (TH+2, W, Cin) row-extended band; halo rows zeroed at image borders
    x = x_ref[0]                                                   # (TH, W, Cin) bf16
    top = top_ref[0] * jnp.where(r == 0, 0.0, 1.0).astype(x.dtype)
    bot = bot_ref[0] * jnp.where(r == r_last, 0.0, 1.0).astype(x.dtype)
    xr = jnp.concatenate([top, x, bot], axis=0)                    # (TH+2, W, Cin)

    # ---- column halo + K-packing of the 3 column taps into the lane dim
    zcol = jnp.zeros((TH + 2, 1, Cin), xr.dtype)
    x_l = jnp.concatenate([zcol, xr[:, :W - 1, :]], axis=1)        # tap at column w-1
    x_r = jnp.concatenate([xr[:, 1:, :], zcol], axis=1)            # tap at column w+1
    xc = jnp.concatenate([x_l, xr, x_r], axis=2)                   # (TH+2, W, 3*Cin)

    # ---- 3 MXU matmuls (one per row tap), K = 3*Cin, f32 accumulation
    wf = wf_ref[0]                                                 # (3, 3*Cin, Cout) bf16
    acc = jnp.zeros((TH * W, Cout), jnp.float32)
    for dh in range(3):
        tap = xc[dh:dh + TH].reshape(TH * W, 3 * Cin)              # outer-dim slice, lane intact
        acc = acc + jnp.dot(tap, wf[dh], preferred_element_type=jnp.float32)

    # ---- f32 epilogue: noise + bias + fused leaky relu (* sqrt(2)) [+ encoder skip]
    y = acc.reshape(TH, W, Cout)
    y = y + nw_ref[0, 0] * noise_ref[...][:, :, None]
    y = y + bias_ref[0][None, None, :]
    y = jnp.where(y >= 0.0, y, 0.2 * y) * math.sqrt(2.0)
    if with_skip:
        y = y + skip_ref[0].astype(jnp.float32)
    out_ref[0] = y.astype(out_ref.dtype)

    # ---- fused to_img: modulated 1x1 conv (demodulate=False) to the wavelet-frequency map
    if with_toimg:
        Cf = freq_ref.shape[3]
        tw = tw_ref[0]                                             # (Cout, Cf) bf16
        f = jnp.dot(y.reshape(TH * W, Cout).astype(tw.dtype), tw,
                    preferred_element_type=jnp.float32)
        f = f + tb_ref[0][None, :]
        freq_ref[0] = f.reshape(TH, W, Cf).astype(freq_ref.dtype)


def _idwt_kernel(ll_ref, lh_ref, hl_ref, hh_ref, s_ref, out_ref, *, apply_tanh):
    """Inverse Haar (db1) DWT with fused per-band style modulation and optional tanh.

    Emits the row tile already sub-pixel interleaved as (TH, 2, 2W, C); the wrapper reshape
    (B, H, 2, 2W, C) -> (B, 2H, 2W, C) is a free row-major reinterpretation.
    """
    s = s_ref[0]                                                   # (4, C) f32
    ll = ll_ref[0].astype(jnp.float32) * s[0][None, None, :]
    lh = lh_ref[0].astype(jnp.float32) * s[1][None, None, :]
    hl = hl_ref[0].astype(jnp.float32) * s[2][None, None, :]
    hh = hh_ref[0].astype(jnp.float32) * s[3][None, None, :]

    a = 0.5 * (ll + lh + hl + hh)      # (2h,   2w)
    b = 0.5 * (ll + lh - hl - hh)      # (2h,   2w+1)
    c = 0.5 * (ll - lh + hl - hh)      # (2h+1, 2w)
    d = 0.5 * (ll - lh - hl + hh)      # (2h+1, 2w+1)
    if apply_tanh:
        a, b, c, d = jnp.tanh(a), jnp.tanh(b), jnp.tanh(c), jnp.tanh(d)

    TH, W, C = a.shape
    p0 = jnp.stack([a, b], axis=2).reshape(TH, 2 * W, C)           # even output rows
    p1 = jnp.stack([c, d], axis=2).reshape(TH, 2 * W, C)           # odd output rows
    v = jnp.stack([p0, p1], axis=1)                                # (TH, 2, 2W, C)
    out_ref[0] = v.astype(out_ref.dtype)


# ----------------------------------------------------------------------------------------------
# Pallas wrappers
# ----------------------------------------------------------------------------------------------

_VMEM_LIMIT = 48 * 1024 * 1024   # explicit scoped-VMEM cap, safe on v5e/v6e/v7x


def _row_tile(H, cap):
    t = min(H, cap)
    while H % t:
        t -= 1
    return t


def styled_dwconv(x, w_fold, noise2d, noise_w, act_bias, skip=None,
                  timg_w=None, timg_bias=None, out_dtype=jnp.bfloat16,
                  freq_dtype=jnp.float32, row_tile=32):
    """x: (B,H,W,Cin) NHWC, w_fold: (B,9,Cin,Cout) folded weight.

    Returns (B,H,W,Cout) [and (B,H,W,Cf) freq when timg_w is given].
    """
    B, H, W, Cin = x.shape
    Cout = w_fold.shape[-1]
    TH = _row_tile(H, row_tile)
    RT = H // TH
    with_skip = skip is not None
    with_toimg = timg_w is not None

    x_bf = x.astype(jnp.bfloat16)
    wf = w_fold.reshape(B, 3, 3 * Cin, Cout).astype(jnp.bfloat16)   # taps K-packed over dw
    nw = jnp.reshape(jnp.asarray(noise_w, jnp.float32), (1, 1))
    bias2 = jnp.reshape(act_bias, (1, Cout)).astype(jnp.float32)

    args = [x_bf, x_bf, x_bf, wf, noise2d.astype(jnp.float32), nw, bias2]
    in_specs = [
        pl.BlockSpec((1, TH, W, Cin), lambda b, r: (b, r, 0, 0)),
        pl.BlockSpec((1, 1, W, Cin),
                     lambda b, r: (b, jnp.maximum(r * TH - 1, 0), 0, 0)),
        pl.BlockSpec((1, 1, W, Cin),
                     lambda b, r: (b, jnp.minimum(r * TH + TH, H - 1), 0, 0)),
        pl.BlockSpec((1, 3, 3 * Cin, Cout), lambda b, r: (b, 0, 0, 0)),
        pl.BlockSpec((TH, W), lambda b, r: (r, 0)),
        pl.BlockSpec(memory_space=pltpu.MemorySpace.SMEM),           # scalar noise weight
        pl.BlockSpec((1, Cout), lambda b, r: (0, 0)),
    ]
    if with_skip:
        args.append(skip.astype(jnp.bfloat16))                       # bf16 skip DMA
        in_specs.append(pl.BlockSpec((1, TH, W, Cout), lambda b, r: (b, r, 0, 0)))
    if with_toimg:
        Cf = timg_w.shape[-1]
        args.append(timg_w.astype(jnp.bfloat16))
        args.append(jnp.reshape(timg_bias, (1, Cf)).astype(jnp.float32))
        in_specs.append(pl.BlockSpec((1, Cout, Cf), lambda b, r: (b, 0, 0)))
        in_specs.append(pl.BlockSpec((1, Cf), lambda b, r: (0, 0)))

    out_shapes = [jax.ShapeDtypeStruct((B, H, W, Cout), out_dtype)]
    out_specs = [pl.BlockSpec((1, TH, W, Cout), lambda b, r: (b, r, 0, 0))]
    if with_toimg:
        Cf = timg_w.shape[-1]
        out_shapes.append(jax.ShapeDtypeStruct((B, H, W, Cf), freq_dtype))
        out_specs.append(pl.BlockSpec((1, TH, W, Cf), lambda b, r: (b, r, 0, 0)))

    kern = functools.partial(_dwconv_kernel, with_skip=with_skip, with_toimg=with_toimg)
    return pl.pallas_call(
        kern,
        out_shape=tuple(out_shapes) if with_toimg else out_shapes[0],
        grid=(B, RT),
        in_specs=in_specs,
        out_specs=tuple(out_specs) if with_toimg else out_specs[0],
        compiler_params=pltpu.CompilerParams(
            dimension_semantics=("parallel", "parallel"),
            vmem_limit_bytes=_VMEM_LIMIT),
    )(*args)


def idwt_pallas(ll, lh, hl, hh, scales, apply_tanh=False, out_dtype=jnp.bfloat16,
                row_tile=32):
    """Inverse Haar DWT: 4 x (B,H,W,C) sub-bands + (B,4,C) scales -> (B,2H,2W,C)."""
    B, H, W, C = ll.shape
    TH = _row_tile(H, row_tile)
    RT = H // TH
    band_spec = pl.BlockSpec((1, TH, W, C), lambda b, r: (b, r, 0, 0))
    kern = functools.partial(_idwt_kernel, apply_tanh=apply_tanh)
    out = pl.pallas_call(
        kern,
        out_shape=jax.ShapeDtypeStruct((B, H, 2, 2 * W, C), out_dtype),
        grid=(B, RT),
        in_specs=[band_spec] * 4 + [pl.BlockSpec((1, 4, C), lambda b, r: (b, 0, 0))],
        out_specs=pl.BlockSpec((1, TH, 2, 2 * W, C), lambda b, r: (b, r, 0, 0, 0)),
        compiler_params=pltpu.CompilerParams(
            dimension_semantics=("parallel", "parallel"),
            vmem_limit_bytes=_VMEM_LIMIT),
    )(ll, lh, hl, hh, scales.astype(jnp.float32))
    # free row-major reinterpretation: (B, H, 2, 2W, C) -> (B, 2H, 2W, C)
    return out.reshape(B, 2 * H, 2 * W, C)


# ----------------------------------------------------------------------------------------------
# Glue: EqualLinear style projections, weight folding, block / network forward
# ----------------------------------------------------------------------------------------------

def equal_linear(x, w, b, lr_mul=1.0):
    """EqualLinear: x (B, in) @ (w.T * scale) + b, w is (out, in) like nn.Linear."""
    scale = (1.0 / math.sqrt(w.shape[1])) * lr_mul
    return x @ (w.T * scale) + b * lr_mul


def styled_conv_apply(x, style_vec, noise2d, p, skip=None, timg=None,
                      out_dtype=jnp.bfloat16):
    """ModulatedDWConv2d (demodulate=True) + NoiseInjection + FusedLeakyReLU [+ skip, + to_img].

    Modulation and demodulation are folded into a per-sample (9, Cin, Cout) weight
    (algebraically exact StyleGAN2 demodulation on the equivalent full dw*pw weight).
    """
    cin = p['w_dw'].shape[2]
    s_lin = equal_linear(style_vec, p['style_w'], p['style_b'])            # (B, Cin)
    s_mod = (1.0 / math.sqrt(cin * 9)) * s_lin                             # kernel_size = 3
    w_dwpw = p['w_dw'].reshape(9, cin)[:, :, None] * p['w_pw'][None, :, :]  # (9, Cin, Cout)
    w_mod = s_mod[:, None, :, None] * w_dwpw[None]                         # (B, 9, Cin, Cout)
    demod = lax.rsqrt(jnp.sum(w_mod * w_mod, axis=(1, 2)) + 1e-8)          # (B, Cout)
    w_fold = w_mod * demod[:, None, None, :]                               # (B, 9, Cin, Cout)
    timg_w = timg_bias = None
    if timg is not None:
        timg_w, timg_bias = timg
    return styled_dwconv(x, w_fold, noise2d, p['noise_w'], p['act_bias'],
                         skip=skip, timg_w=timg_w, timg_bias=timg_bias,
                         out_dtype=out_dtype)


def idwt_upsample(hidden, style_vec, style_w, style_b):
    """IDWTUpsaplme: style-modulate, split into (LL, LH, HL, HH), inverse Haar -> 2x upsample."""
    B, H, W, cin = hidden.shape
    c4 = cin // 4
    s = equal_linear(style_vec, style_w, style_b)                          # (B, Cin)
    ll = hidden[..., :c4]
    high = hidden[..., c4:].reshape(B, H, W, c4, 3)
    s_high = s[:, c4:].reshape(B, c4, 3)
    scales = jnp.stack([s[:, :c4], s_high[..., 0], s_high[..., 1], s_high[..., 2]], axis=1)
    return idwt_pallas(ll, high[..., 0], high[..., 1], high[..., 2], scales,
                       apply_tanh=False, out_dtype=jnp.bfloat16)


def block_forward(hidden, style3, en_feat, noise_pair, p):
    """MobileSynthesisBlock (wsize() == 3). hidden NHWC (B,H,W,Cin) -> ((B,2H,2W,Cout), freq)."""
    up = idwt_upsample(hidden, style3[:, 0, :], p['up_style_w'], p['up_style_b'])
    h = styled_conv_apply(up, style3[:, 0, :], noise_pair[0], p['conv1'])
    # to_img: ModulatedConv2d(Cout, 12, k=1, demodulate=False); modulation folded into the
    # per-sample weight and the conv fused into conv2's epilogue.
    cout = p['timg_w'].shape[0]
    s_lin = equal_linear(style3[:, 2, :], p['timg_style_w'], p['timg_style_b'])
    s_mod = (1.0 / math.sqrt(cout)) * s_lin                                # (B, Cout)
    timg_w_fold = s_mod[:, :, None] * p['timg_w'][None, :, :]              # (B, Cout, 12)
    # TODO(synk): exact en_feats fusion of the reference block is unknown; additive skip fused
    # into conv2's epilogue.
    h, freq = styled_conv_apply(h, style3[:, 1, :], noise_pair[1], p['conv2'],
                                skip=en_feat, timg=(timg_w_fold, p['timg_bias']))
    return h, freq


def mobile_synthesis_forward(style, en_feats_nchw, params, noise=None, noise_key=None):
    """Forward pass mirroring MobileSynthesisNetwork_v2.forward (public NCHW interface)."""
    out = {'noise': [], 'freq': [], 'img': None, 'en_feats': en_feats_nchw}
    en_feats = [jnp.transpose(f, (0, 2, 3, 1)) for f in en_feats_nchw]      # NCHW -> NHWC
    hidden = en_feats[0]
    wsize_blk = 3
    for i, p in enumerate(params):
        size = 2 * hidden.shape[2]                                          # 2 * hidden.size(-1)
        if noise is not None and i < len(noise) and noise[i] is not None:
            n = noise[i]                                                    # (2, 1, size, size)
        else:
            noise_key, sub = jax.random.split(noise_key)
            n = jax.random.normal(sub, (2, 1, size, size), jnp.float32)     # NoiseManager(randn)
        out['noise'].append(n)
        if style.ndim == 2:
            style3 = jnp.broadcast_to(style[:, None, :],
                                      (style.shape[0], wsize_blk, style.shape[1]))
        else:
            s0 = wsize_blk * i + 1
            style3 = style[:, s0:s0 + wsize_blk, :]
        hidden, freq = block_forward(hidden, style3, en_feats[i + 1], (n[0, 0], n[1, 0]), p)
        out['freq'].append(freq)
    # dwt_to_img: low = freq[:, :3], high = freq[:, 3:].view(b, 3, 3, h, w); idwt; tanh
    freq = out['freq'][-1]
    B, h, w, _ = freq.shape
    ll = freq[..., :3]
    high = freq[..., 3:].reshape(B, h, w, 3, 3)
    ones = jnp.ones((B, 4, 3), jnp.float32)
    img = idwt_pallas(ll, high[..., 0], high[..., 1], high[..., 2], ones,
                      apply_tanh=True, out_dtype=jnp.float32)               # out_act = tanh fused
    out['freq'] = [jnp.transpose(f, (0, 3, 1, 2)) for f in out['freq']]     # back to NCHW
    out['img'] = jnp.transpose(img, (0, 3, 1, 2))
    return out


# ----------------------------------------------------------------------------------------------
# Deterministic parameter initialization (shapes per module __init__)
# ----------------------------------------------------------------------------------------------

def init_moddw(key, cin, cout, style_dim):
    k = jax.random.split(key, 3)
    return dict(
        style_w=jax.random.normal(k[0], (cin, style_dim), jnp.float32),     # EqualLinear weight
        style_b=jnp.ones((cin,), jnp.float32),                              # bias_init = 1
        w_dw=jax.random.normal(k[1], (3, 3, cin), jnp.float32),             # depthwise (Cin,1,3,3)
        w_pw=jax.random.normal(k[2], (cin, cout), jnp.float32),             # permuted (Cout,Cin,1,1)
        noise_w=jnp.float32(0.1),                                           # NoiseInjection weight
        act_bias=jnp.zeros((cout,), jnp.float32),                           # FusedLeakyReLU bias
    )


def init_params(key, style_dim, channels):
    params = []
    cin = channels[0]
    keys = jax.random.split(key, len(channels))
    for i, cout in enumerate(channels[1:]):
        k = jax.random.split(keys[i], 5)
        params.append(dict(
            up_style_w=jax.random.normal(k[0], (cin, style_dim), jnp.float32),
            up_style_b=jnp.ones((cin,), jnp.float32),
            conv1=init_moddw(k[1], cin // 4, cout, style_dim),
            conv2=init_moddw(k[2], cout, cout, style_dim),
            timg_style_w=jax.random.normal(k[3], (cout, style_dim), jnp.float32),
            timg_style_b=jnp.ones((cout,), jnp.float32),
            timg_w=jax.random.normal(k[4], (cout, 12), jnp.float32),        # (12, Cout, 1, 1)
            timg_bias=jnp.zeros((12,), jnp.float32),
        ))
        cin = cout
    return params


# ----------------------------------------------------------------------------------------------
# Demo + numerical self-checks (exercise the multi-row-tile halo path and the fused interleave)
# ----------------------------------------------------------------------------------------------

if __name__ == "__main__":
    key = jax.random.PRNGKey(0)

    # ---- check 1: row-tiled dw-conv (row_tile=8 on H=16 -> RT=2, interior halos exercised)
    kx, kw, kn, kb_, ksk, kt = jax.random.split(key, 6)
    Bc, Hc, Wc, Ci, Co = 2, 16, 16, 4, 16
    xt = jax.random.normal(kx, (Bc, Hc, Wc, Ci), jnp.float32).astype(jnp.bfloat16)
    w9 = 0.2 * jax.random.normal(kw, (Bc, 9, Ci, Co), jnp.float32)
    nmap = jax.random.normal(kn, (Hc, Wc), jnp.float32)
    bvec = 0.1 * jax.random.normal(kb_, (Co,), jnp.float32)
    skp = 0.1 * jax.random.normal(ksk, (Bc, Hc, Wc, Co), jnp.float32)
    tw = 0.2 * jax.random.normal(kt, (Bc, Co, 12), jnp.float32)
    tb = jnp.zeros((12,), jnp.float32)
    h_out, f_out = styled_dwconv(xt, w9, nmap, 0.1, bvec, skip=skp,
                                 timg_w=tw, timg_bias=tb, row_tile=8)
    # pure-JAX reference on bf16-rounded operands
    xf = xt.astype(jnp.float32)
    wfr = w9.astype(jnp.bfloat16).astype(jnp.float32)
    xp = jnp.pad(xf, ((0, 0), (1, 1), (1, 1), (0, 0)))
    acc = jnp.zeros((Bc, Hc, Wc, Co), jnp.float32)
    for dh in range(3):
        for dw_ in range(3):
            acc = acc + jnp.einsum('bhwc,bco->bhwo',
                                   xp[:, dh:dh + Hc, dw_:dw_ + Wc, :], wfr[:, dh * 3 + dw_])
    yr = acc + 0.1 * nmap[None, :, :, None] + bvec[None, None, None, :]
    yr = jnp.where(yr >= 0, yr, 0.2 * yr) * math.sqrt(2.0)
    yr = yr + skp.astype(jnp.bfloat16).astype(jnp.float32)
    fr = jnp.einsum('bhwo,bof->bhwf', yr, tw.astype(jnp.bfloat16).astype(jnp.float32)) + tb
    err_h = float(jnp.max(jnp.abs(h_out.astype(jnp.float32) - yr)))
    err_f = float(jnp.max(jnp.abs(f_out - fr)))
    assert err_h < 0.05 * (float(jnp.max(jnp.abs(yr))) + 1e-6), err_h
    assert err_f < 0.05 * (float(jnp.max(jnp.abs(fr))) + 1e-6), err_f

    # ---- check 2: IDWT with fused sub-pixel interleave (row_tile=8 on H=16 -> RT=2)
    kbnd = jax.random.split(key, 6)
    B2, Hh, Wh, Cc = 2, 16, 16, 4
    bands = [jax.random.normal(kbnd[i], (B2, Hh, Wh, Cc), jnp.float32).astype(jnp.bfloat16)
             for i in range(4)]
    scl = jax.random.normal(kbnd[4], (B2, 4, Cc), jnp.float32)
    up = idwt_pallas(*bands, scl, apply_tanh=False, out_dtype=jnp.float32, row_tile=8)
    bf = [b_.astype(jnp.float32) * scl[:, i, None, None, :] for i, b_ in enumerate(bands)]
    ll_, lh_, hl_, hh_ = bf
    ra = 0.5 * (ll_ + lh_ + hl_ + hh_); rb = 0.5 * (ll_ + lh_ - hl_ - hh_)
    rc = 0.5 * (ll_ - lh_ + hl_ - hh_); rd = 0.5 * (ll_ - lh_ - hl_ + hh_)
    ref_up = jnp.zeros((B2, 2 * Hh, 2 * Wh, Cc), jnp.float32)
    ref_up = ref_up.at[:, 0::2, 0::2].set(ra).at[:, 0::2, 1::2].set(rb)
    ref_up = ref_up.at[:, 1::2, 0::2].set(rc).at[:, 1::2, 1::2].set(rd)
    err_u = float(jnp.max(jnp.abs(up - ref_up)))
    assert err_u < 1e-2 * (float(jnp.max(jnp.abs(ref_up))) + 1e-6), err_u

    # ---- full MobileSynthesisNetwork_v2 forward (small, module-consistent shapes)
    style_dim = 32
    channels = [16, 16, 8]        # 2 synthesis blocks
    B = 2
    H0 = W0 = 4
    n_layers = len(channels) - 1
    n_w = n_layers * 3 + 2        # == MobileSynthesisNetwork_v2.wsize()

    k_params, k_style, k_feats, k_noise = jax.random.split(key, 4)
    params = init_params(k_params, style_dim, channels)
    style = jax.random.normal(k_style, (B, n_w, style_dim), jnp.float32)

    fk = jax.random.split(k_feats, len(channels))
    en_feats = [jax.random.normal(fk[0], (B, channels[0], H0, W0), jnp.float32)]
    for i in range(n_layers):
        s = H0 * (2 ** (i + 1))
        en_feats.append(0.1 * jax.random.normal(fk[i + 1], (B, channels[i + 1], s, s),
                                                jnp.float32))

    out = mobile_synthesis_forward(style, en_feats, params, noise=None, noise_key=k_noise)
    jax.block_until_ready(out['img'])

    final = H0 * (2 ** (n_layers + 1))
    assert out['img'].shape == (B, 3, final, final), out['img'].shape
    assert out['freq'][-1].shape == (B, 12, final // 2, final // 2)
    assert bool(jnp.all(jnp.isfinite(out['img'])))
    print("KERNEL_OK")
</pallas_src>

<mosaic_0001>
module attributes {stable_mosaic.version = 11 : i64} {
  func.func @_dwconv_kernel(%arg0: i32, %arg1: i32, %arg2: memref<1x8x16x4xbf16, #tpu.memory_space<vmem>>, %arg3: memref<1x1x16x4xbf16, #tpu.memory_space<vmem>>, %arg4: memref<1x1x16x4xbf16, #tpu.memory_space<vmem>>, %arg5: memref<1x3x12x16xbf16, #tpu.memory_space<vmem>>, %arg6: memref<8x16xf32, #tpu.memory_space<vmem>>, %arg7: memref<1x1xf32, #tpu.memory_space<smem>>, %arg8: memref<1x16xf32, #tpu.memory_space<vmem>>, %arg9: memref<1x8x16x16xbf16, #tpu.memory_space<vmem>>, %arg10: memref<1x16x12xbf16, #tpu.memory_space<vmem>>, %arg11: memref<1x12xf32, #tpu.memory_space<vmem>>, %arg12: memref<1x8x16x16xbf16, #tpu.memory_space<vmem>>, %arg13: memref<1x8x16x12xf32, #tpu.memory_space<vmem>>) attributes {dimension_semantics = [#tpu.dimension_semantics<parallel>, #tpu.dimension_semantics<parallel>], iteration_bounds = array<i64: 2, 2>, scalar_prefetch = 0 : i64, scratch_operands = 0 : i64, tpu.core_type = #tpu.core_type<tc>, window_params = [{transform_indices = @transform_0, window_bounds = array<i64: 1, 8, 16, 4>}, {transform_indices = @transform_1, window_bounds = array<i64: 1, 1, 16, 4>}, {transform_indices = @transform_2, window_bounds = array<i64: 1, 1, 16, 4>}, {transform_indices = @transform_3, window_bounds = array<i64: 1, 3, 12, 16>}, {transform_indices = @transform_4, window_bounds = array<i64: 8, 16>}, {transform_indices = @transform_5, window_bounds = array<i64: 1, 1>}, {pipeline_mode = #tpu.pipeline_mode<synchronous>, transform_indices = @transform_6, window_bounds = array<i64: 1, 16>}, {transform_indices = @transform_7, window_bounds = array<i64: 1, 8, 16, 16>}, {transform_indices = @transform_8, window_bounds = array<i64: 1, 16, 12>}, {pipeline_mode = #tpu.pipeline_mode<synchronous>, transform_indices = @transform_9, window_bounds = array<i64: 1, 12>}, {transform_indices = @transform_10, window_bounds = array<i64: 1, 8, 16, 16>}, {transform_indices = @transform_11, window_bounds = array<i64: 1, 8, 16, 12>}]} {
    %c0 = arith.constant 0 : index
    %c0_0 = arith.constant 0 : index
    %c0_1 = arith.constant 0 : index
    %c0_2 = arith.constant 0 : index
    %0 = vector.load %arg2[%c0, %c0_0, %c0_1, %c0_2] : memref<1x8x16x4xbf16, #tpu.memory_space<vmem>>, vector<1x8x16x4xbf16>
    %1 = vector.shape_cast %0 : vector<1x8x16x4xbf16> to vector<8x16x4xbf16>
    %c0_3 = arith.constant 0 : index
    %c0_4 = arith.constant 0 : index
    %c0_5 = arith.constant 0 : index
    %c0_6 = arith.constant 0 : index
    %2 = vector.load %arg3[%c0_3, %c0_4, %c0_5, %c0_6] : memref<1x1x16x4xbf16, #tpu.memory_space<vmem>>, vector<1x1x16x4xbf16>
    %3 = vector.shape_cast %2 : vector<1x1x16x4xbf16> to vector<1x16x4xbf16>
    %c0_i32 = arith.constant 0 : i32
    %4 = arith.cmpi eq, %arg1, %c0_i32 : i32
    %cst = arith.constant 0.000000e+00 : f32
    %cst_7 = arith.constant 1.000000e+00 : f32
    %5 = arith.select %4, %cst, %cst_7 : f32
    %6 = arith.truncf %5 : f32 to bf16
    %7 = vector.broadcast %6 : bf16 to vector<1x16x4xbf16>
    %8 = arith.mulf %3, %7 : vector<1x16x4xbf16>
    %c0_8 = arith.constant 0 : index
    %c0_9 = arith.constant 0 : index
    %c0_10 = arith.constant 0 : index
    %c0_11 = arith.constant 0 : index
    %9 = vector.load %arg4[%c0_8, %c0_9, %c0_10, %c0_11] : memref<1x1x16x4xbf16, #tpu.memory_space<vmem>>, vector<1x1x16x4xbf16>
    %10 = vector.shape_cast %9 : vector<1x1x16x4xbf16> to vector<1x16x4xbf16>
    %c1_i32 = arith.constant 1 : i32
    %11 = arith.cmpi eq, %arg1, %c1_i32 : i32
    %cst_12 = arith.constant 0.000000e+00 : f32
    %cst_13 = arith.constant 1.000000e+00 : f32
    %12 = arith.select %11, %cst_12, %cst_13 : f32
    %13 = arith.truncf %12 : f32 to bf16
    %14 = vector.broadcast %13 : bf16 to vector<1x16x4xbf16>
    %15 = arith.mulf %10, %14 : vector<1x16x4xbf16>
    %16 = tpu.concatenate %8, %1, %15 in 0 : vector<1x16x4xbf16>, vector<8x16x4xbf16>, vector<1x16x4xbf16> -> vector<10x16x4xbf16>
    %cst_14 = arith.constant 0.000000e+00 : bf16
    %17 = vector.broadcast %cst_14 : bf16 to vector<10x1x4xbf16>
    %18 = vector.extract_strided_slice %16 {offsets = [0, 0, 0], sizes = [10, 15, 4], strides = [1, 1, 1]} : vector<10x16x4xbf16> to vector<10x15x4xbf16>
    %19 = tpu.concatenate %17, %18 in 1 : vector<10x1x4xbf16>, vector<10x15x4xbf16> -> vector<10x16x4xbf16>
    %20 = vector.extract_strided_slice %16 {offsets = [0, 1, 0], sizes = [10, 15, 4], strides = [1, 1, 1]} : vector<10x16x4xbf16> to vector<10x15x4xbf16>
    %21 = tpu.concatenate %20, %17 in 1 : vector<10x15x4xbf16>, vector<10x1x4xbf16> -> vector<10x16x4xbf16>
    %22 = tpu.concatenate %19, %16, %21 in 2 : vector<10x16x4xbf16>, vector<10x16x4xbf16>, vector<10x16x4xbf16> -> vector<10x16x12xbf16>
    %c0_15 = arith.constant 0 : index
    %c0_16 = arith.constant 0 : index
    %c0_17 = arith.constant 0 : index
    %c0_18 = arith.constant 0 : index
    %23 = vector.load %arg5[%c0_15, %c0_16, %c0_17, %c0_18] : memref<1x3x12x16xbf16, #tpu.memory_space<vmem>>, vector<1x3x12x16xbf16>
    %24 = vector.shape_cast %23 : vector<1x3x12x16xbf16> to vector<3x12x16xbf16>
    %cst_19 = arith.constant 0.000000e+00 : f32
    %25 = vector.broadcast %cst_19 : f32 to vector<128x16xf32>
    %26 = vector.extract_strided_slice %22 {offsets = [0, 0, 0], sizes = [8, 16, 12], strides = [1, 1, 1]} : vector<10x16x12xbf16> to vector<8x16x12xbf16>
    %27 = vector.shape_cast %26 : vector<8x16x12xbf16> to vector<128x12xbf16>
    %28 = vector.extract_strided_slice %24 {offsets = [0, 0, 0], sizes = [1, 12, 16], strides = [1, 1, 1]} : vector<3x12x16xbf16> to vector<1x12x16xbf16>
    %29 = vector.shape_cast %28 : vector<1x12x16xbf16> to vector<12x16xbf16>
    %cst_20 = arith.constant dense<0.000000e+00> : vector<128x16xf32>
    %30 = tpu.matmul %27, %29, %cst_20 {dimension_numbers = #tpu.dot_dimension_numbers<[1], [0], [0], [1], [0, 0, 1, 1], [], []>} : vector<128x12xbf16>, vector<12x16xbf16>, vector<128x16xf32> -> vector<128x16xf32>
    %31 = arith.addf %25, %30 : vector<128x16xf32>
    %32 = vector.extract_strided_slice %22 {offsets = [1, 0, 0], sizes = [8, 16, 12], strides = [1, 1, 1]} : vector<10x16x12xbf16> to vector<8x16x12xbf16>
    %33 = vector.shape_cast %32 : vector<8x16x12xbf16> to vector<128x12xbf16>
    %34 = vector.extract_strided_slice %24 {offsets = [1, 0, 0], sizes = [1, 12, 16], strides = [1, 1, 1]} : vector<3x12x16xbf16> to vector<1x12x16xbf16>
    %35 = vector.shape_cast %34 : vector<1x12x16xbf16> to vector<12x16xbf16>
    %cst_21 = arith.constant dense<0.000000e+00> : vector<128x16xf32>
    %36 = tpu.matmul %33, %35, %cst_21 {dimension_numbers = #tpu.dot_dimension_numbers<[1], [0], [0], [1], [0, 0, 1, 1], [], []>} : vector<128x12xbf16>, vector<12x16xbf16>, vector<128x16xf32> -> vector<128x16xf32>
    %37 = arith.addf %31, %36 : vector<128x16xf32>
    %38 = vector.extract_strided_slice %22 {offsets = [2, 0, 0], sizes = [8, 16, 12], strides = [1, 1, 1]} : vector<10x16x12xbf16> to vector<8x16x12xbf16>
    %39 = vector.shape_cast %38 : vector<8x16x12xbf16> to vector<128x12xbf16>
    %40 = vector.extract_strided_slice %24 {offsets = [2, 0, 0], sizes = [1, 12, 16], strides = [1, 1, 1]} : vector<3x12x16xbf16> to vector<1x12x16xbf16>
    %41 = vector.shape_cast %40 : vector<1x12x16xbf16> to vector<12x16xbf16>
    %cst_22 = arith.constant dense<0.000000e+00> : vector<128x16xf32>
    %42 = tpu.matmul %39, %41, %cst_22 {dimension_numbers = #tpu.dot_dimension_numbers<[1], [0], [0], [1], [0, 0, 1, 1], [], []>} : vector<128x12xbf16>, vector<12x16xbf16>, vector<128x16xf32> -> vector<128x16xf32>
    %43 = arith.addf %37, %42 : vector<128x16xf32>
    %44 = vector.shape_cast %43 : vector<128x16xf32> to vector<8x16x16xf32>
    %c0_23 = arith.constant 0 : index
    %c0_24 = arith.constant 0 : index
    %45 = memref.load %arg7[%c0_23, %c0_24] : memref<1x1xf32, #tpu.memory_space<smem>>
    %c0_25 = arith.constant 0 : index
    %c0_26 = arith.constant 0 : index
    %46 = vector.load %arg6[%c0_25, %c0_26] : memref<8x16xf32, #tpu.memory_space<vmem>>, vector<8x16xf32>
    %47 = vector.shape_cast %46 : vector<8x16xf32> to vector<8x16x1xf32>
    %48 = vector.broadcast %45 : f32 to vector<8x16x1xf32>
    %49 = arith.mulf %48, %47 : vector<8x16x1xf32>
    %50 = vector.broadcast %49 : vector<8x16x1xf32> to vector<8x16x16xf32>
    %51 = arith.addf %44, %50 : vector<8x16x16xf32>
    %c0_27 = arith.constant 0 : index
    %c0_28 = arith.constant 0 : index
    %52 = vector.load %arg8[%c0_27, %c0_28] : memref<1x16xf32, #tpu.memory_space<vmem>>, vector<1x16xf32>
    %53 = vector.shape_cast %52 : vector<1x16xf32> to vector<16xf32>
    %54 = vector.shape_cast %53 : vector<16xf32> to vector<1x1x16xf32>
    %55 = vector.broadcast %54 : vector<1x1x16xf32> to vector<8x16x16xf32>
    %56 = arith.addf %51, %55 : vector<8x16x16xf32>
    %cst_29 = arith.constant 0.000000e+00 : f32
    %57 = vector.broadcast %cst_29 : f32 to vector<8x16x16xf32>
    %58 = arith.cmpf oge, %56, %57 : vector<8x16x16xf32>
    %cst_30 = arith.constant 2.000000e-01 : f32
    %59 = vector.broadcast %cst_30 : f32 to vector<8x16x16xf32>
    %60 = arith.mulf %59, %56 : vector<8x16x16xf32>
    %61 = arith.select %58, %56, %60 : vector<8x16x16xi1>, vector<8x16x16xf32>
    %cst_31 = arith.constant 1.41421354 : f32
    %62 = vector.broadcast %cst_31 : f32 to vector<8x16x16xf32>
    %63 = arith.mulf %61, %62 : vector<8x16x16xf32>
    %c0_32 = arith.constant 0 : index
    %c0_33 = arith.constant 0 : index
    %c0_34 = arith.constant 0 : index
    %c0_35 = arith.constant 0 : index
    %64 = vector.load %arg9[%c0_32, %c0_33, %c0_34, %c0_35] : memref<1x8x16x16xbf16, #tpu.memory_space<vmem>>, vector<1x8x16x16xbf16>
    %65 = vector.shape_cast %64 : vector<1x8x16x16xbf16> to vector<8x16x16xbf16>
    %66 = arith.extf %65 : vector<8x16x16xbf16> to vector<8x16x16xf32>
    %67 = arith.addf %63, %66 : vector<8x16x16xf32>
    %68 = arith.truncf %67 : vector<8x16x16xf32> to vector<8x16x16xbf16>
    %c0_36 = arith.constant 0 : index
    %c0_37 = arith.constant 0 : index
    %c0_38 = arith.constant 0 : index
    %c0_39 = arith.constant 0 : index
    %69 = vector.load %arg12[%c0_36, %c0_37, %c0_38, %c0_39] : memref<1x8x16x16xbf16, #tpu.memory_space<vmem>>, vector<1x8x16x16xbf16>
    %70 = vector.shape_cast %69 : vector<1x8x16x16xbf16> to vector<8x16x16xbf16>
    %71 = vector.shape_cast %68 : vector<8x16x16xbf16> to vector<1x8x16x16xbf16>
    tpu.vector_store %arg12[%c0_36, %c0_37, %c0_38, %c0_39], %71 {strides = array<i32>} : memref<1x8x16x16xbf16, #tpu.memory_space<vmem>>, vector<1x8x16x16xbf16>,
    %c0_40 = arith.constant 0 : index
    %c0_41 = arith.constant 0 : index
    %c0_42 = arith.constant 0 : index
    %72 = vector.load %arg10[%c0_40, %c0_41, %c0_42] : memref<1x16x12xbf16, #tpu.memory_space<vmem>>, vector<1x16x12xbf16>
    %73 = vector.shape_cast %72 : vector<1x16x12xbf16> to vector<16x12xbf16>
    %74 = vector.shape_cast %67 : vector<8x16x16xf32> to vector<128x16xf32>
    %75 = arith.truncf %74 : vector<128x16xf32> to vector<128x16xbf16>
    %cst_43 = arith.constant dense<0.000000e+00> : vector<128x12xf32>
    %76 = tpu.matmul %75, %73, %cst_43 {dimension_numbers = #tpu.dot_dimension_numbers<[1], [0], [0], [1], [0, 0, 1, 1], [], []>} : vector<128x16xbf16>, vector<16x12xbf16>, vector<128x12xf32> -> vector<128x12xf32>
    %c0_44 = arith.constant 0 : index
    %c0_45 = arith.constant 0 : index
    %77 = vector.load %arg11[%c0_44, %c0_45] : memref<1x12xf32, #tpu.memory_space<vmem>>, vector<1x12xf32>
    %78 = vector.shape_cast %77 : vector<1x12xf32> to vector<12xf32>
    %79 = vector.shape_cast %78 : vector<12xf32> to vector<1x12xf32>
    %80 = vector.broadcast %79 : vector<1x12xf32> to vector<128x12xf32>
    %81 = arith.addf %76, %80 : vector<128x12xf32>
    %82 = vector.shape_cast %81 : vector<128x12xf32> to vector<8x16x12xf32>
    %c0_46 = arith.constant 0 : index
    %c0_47 = arith.constant 0 : index
    %c0_48 = arith.constant 0 : index
    %c0_49 = arith.constant 0 : index
    %83 = vector.load %arg13[%c0_46, %c0_47, %c0_48, %c0_49] : memref<1x8x16x12xf32, #tpu.memory_space<vmem>>, vector<1x8x16x12xf32>
    %84 = vector.shape_cast %83 : vector<1x8x16x12xf32> to vector<8x16x12xf32>
    %85 = vector.shape_cast %82 : vector<8x16x12xf32> to vector<1x8x16x12xf32>
    tpu.vector_store %arg13[%c0_46, %c0_47, %c0_48, %c0_49], %85 {strides = array<i32>} : memref<1x8x16x12xf32, #tpu.memory_space<vmem>>, vector<1x8x16x12xf32>,
    return
  }
  func.func @transform_0(%arg0: i32, %arg1: i32) -> (i32, i32, i32, i32) {
    %c0_i32 = arith.constant 0 : i32
    %c0_i32_0 = arith.constant 0 : i32
    %c0_i32_1 = arith.constant 0 : i32
    return %arg0, %arg1, %c0_i32, %c0_i32_0 : i32, i32, i32, i32
  }
  func.func @transform_1(%arg0: i32, %arg1: i32) -> (i32, i32, i32, i32) {
    %c8_i32 = arith.constant 8 : i32
    %0 = arith.muli %arg1, %c8_i32 : i32
    %c1_i32 = arith.constant 1 : i32
    %1 = arith.subi %0, %c1_i32 : i32
    %c0_i32 = arith.constant 0 : i32
    %2 = arith.maxsi %1, %c0_i32 : i32
    %c0_i32_0 = arith.constant 0 : i32
    %c0_i32_1 = arith.constant 0 : i32
    %c0_i32_2 = arith.constant 0 : i32
    return %arg0, %2, %c0_i32_0, %c0_i32_1 : i32, i32, i32, i32
  }
  func.func @transform_2(%arg0: i32, %arg1: i32) -> (i32, i32, i32, i32) {
    %c8_i32 = arith.constant 8 : i32
    %0 = arith.muli %arg1, %c8_i32 : i32
    %c8_i32_0 = arith.constant 8 : i32
    %1 = arith.addi %0, %c8_i32_0 : i32
    %c15_i32 = arith.constant 15 : i32
    %2 = arith.minsi %1, %c15_i32 : i32
    %c0_i32 = arith.constant 0 : i32
    %c0_i32_1 = arith.constant 0 : i32
    %c0_i32_2 = arith.constant 0 : i32
    return %arg0, %2, %c0_i32, %c0_i32_1 : i32, i32, i32, i32
  }
  func.func @transform_3(%arg0: i32, %arg1: i32) -> (i32, i32, i32, i32) {
    %c0_i32 = arith.constant 0 : i32
    %c0_i32_0 = arith.constant 0 : i32
    %c0_i32_1 = arith.constant 0 : i32
    %c0_i32_2 = arith.constant 0 : i32
    return %arg0, %c0_i32, %c0_i32_0, %c0_i32_1 : i32, i32, i32, i32
  }
  func.func @transform_4(%arg0: i32, %arg1: i32) -> (i32, i32) {
    %c0_i32 = arith.constant 0 : i32
    %c0_i32_0 = arith.constant 0 : i32
    return %arg1, %c0_i32 : i32, i32
  }
  func.func @transform_5(%arg0: i32, %arg1: i32) -> (i32, i32) {
    %c0_i32 = arith.constant 0 : i32
    %c0_i32_0 = arith.constant 0 : i32
    %c0_i32_1 = arith.constant 0 : i32
    return %c0_i32, %c0_i32_0 : i32, i32
  }
  func.func @transform_6(%arg0: i32, %arg1: i32) -> (i32, i32) {
    %c0_i32 = arith.constant 0 : i32
    %c0_i32_0 = arith.constant 0 : i32
    %c0_i32_1 = arith.constant 0 : i32
    return %c0_i32, %c0_i32_0 : i32, i32
  }
  func.func @transform_7(%arg0: i32, %arg1: i32) -> (i32, i32, i32, i32) {
    %c0_i32 = arith.constant 0 : i32
    %c0_i32_0 = arith.constant 0 : i32
    %c0_i32_1 = arith.constant 0 : i32
    return %arg0, %arg1, %c0_i32, %c0_i32_0 : i32, i32, i32, i32
  }
  func.func @transform_8(%arg0: i32, %arg1: i32) -> (i32, i32, i32) {
    %c0_i32 = arith.constant 0 : i32
    %c0_i32_0 = arith.constant 0 : i32
    %c0_i32_1 = arith.constant 0 : i32
    return %arg0, %c0_i32, %c0_i32_0 : i32, i32, i32
  }
  func.func @transform_9(%arg0: i32, %arg1: i32) -> (i32, i32) {
    %c0_i32 = arith.constant 0 : i32
    %c0_i32_0 = arith.constant 0 : i32
    %c0_i32_1 = arith.constant 0 : i32
    return %c0_i32, %c0_i32_0 : i32, i32
  }
  func.func @transform_10(%arg0: i32, %arg1: i32) -> (i32, i32, i32, i32) {
    %c0_i32 = arith.constant 0 : i32
    %c0_i32_0 = arith.constant 0 : i32
    %c0_i32_1 = arith.constant 0 : i32
    return %arg0, %arg1, %c0_i32, %c0_i32_0 : i32, i32, i32, i32
  }
  func.func @transform_11(%arg0: i32, %arg1: i32) -> (i32, i32, i32, i32) {
    %c0_i32 = arith.constant 0 : i32
    %c0_i32_0 = arith.constant 0 : i32
    %c0_i32_1 = arith.constant 0 : i32
    return %arg0, %arg1, %c0_i32, %c0_i32_0 : i32, i32, i32, i32
  }
}

</mosaic_0001>

<bundles_post_ra>
// kernel: tpu_custom_call.1
= control target key start
LH: loop header
LB: loop body
LE: loop exit
PB: predicated region body
PF: predicated region fallthrough
CT: control target
= control target key end

     0   :  { %s3352_s0 = inlined_call_operand.vmem [shape: bf16[2,16,16,4], index: 0, kind: input, shape index: {}]   ;;  %s3353_s1 = inlined_call_operand.vmem [shape: bf16[2,16,16,4], index: 1, kind: input, shape index: {}]   ;;  %s3354_s2 = inlined_call_operand.vmem [shape: bf16[2,16,16,4], index: 2, kind: input, shape index: {}]   ;;  %s3355_s3 = inlined_call_operand.vmem [shape: bf16[2,3,12,16], index: 3, kind: input, shape index: {}]   ;;  %s3356_s4 = inlined_call_operand.vmem [shape: f32[16,16], index: 4, kind: input, shape index: {}]   ;;  %s3357_s5 = inlined_call_operand.<no memory space> [shape: f32[1,1], index: 5, kind: input, shape index: {}]   ;;  %s3358_s6 = inlined_call_operand.vmem [shape: f32[1,16], index: 6, kind: input, shape index: {}]   ;;  %s3359_s7 = inlined_call_operand.vmem [shape: bf16[2,16,16,16], index: 7, kind: input, shape index: {}]   ;;  %s3360_s8 = inlined_call_operand.vmem [shape: bf16[2,16,12], index: 8, kind: input, shape index: {}]   ;;  %s3361_s9 = inlined_call_operand.vmem [shape: f32[1,12], index: 9, kind: input, shape index: {}]   ;;  %s3362_s10 = inlined_call_operand.hbm [shape: bf16[2,16,16,16], index: 10, kind: output, shape index: {0}]   ;;  %s3363_s11 = inlined_call_operand.vmem [shape: f32[2,16,16,12], index: 11, kind: output, shape index: {1}]  }
   0x1   :  { %3373 = sst [smem:[#allocation15_spill]] %s3361_s9 }
   0x2   :  { %3374 = sst [smem:[#allocation16_spill]] %s3363_s11 }
   0x3   :  { %17 = sst [smem:[#allocation2]] %s3357_s5 }
   0x4   :  { %18 = vsyncpa [#allocation4], 0 }
   0x5   :  { %20 = vsyncpa [#allocation4 + $0x1], 0  ;;  %s2687_s19 = smov 0   ;;  %s2689_s20 = smov 0  }
   0x6   :  { %s2691_s21 = smov 0   ;;  %s2693_s22 = smov 0  }
   0x7   :  { %s2695_s23 = smov 0   ;;  %s2697_s24 = smov 0  }
   0x8   :  { %s2699_s25 = smov 0   ;;  %s2701_s26 = smov 0  }
   0x9 LB: > { %3375 = sst [smem:[#allocation6_spill]] %s2590_s19  ;;  %s2119_s5 = sadd.s32 4294967295, %s2618_s26   ;;  %s2618_s26 = sphi %s2701_s26, %s26_s26   ;;  %s2614_s25 = sphi %s2699_s25, %s3406_s25   ;;  %s2610_s24 = sphi %s2697_s24, %s3405_s24   ;;  %s2606_s23 = sphi %s2695_s23, %s3404_s23   ;;  %s2602_s22 = sphi %s2693_s22, %s3403_s22   ;;  %s2598_s21 = sphi %s2691_s21, %s3402_s21   ;;  %s2594_s20 = sphi %s2689_s20, %s3408_s20   ;;  %s2590_s19 = sphi %s2687_s19, %s3407_s19  }
   0xa   : > { %3376 = sst [smem:[#allocation7_spill]] %s2598_s21  ;;  %s2120_s27 = sadd.s32 4294967294, %s2618_s26  }
   0xb   : > { %3377 = sst [smem:[#allocation8_spill]] %s2610_s24  ;;  %s35_s28 = sadd.s32 1, %s2610_s24 }
   0xc   : > { %3378 = sst [smem:[#allocation9_spill]] %s2614_s25  ;;  %p36_p0 = scmp.ge.s32.totalorder %s35_s28, 2 }
   0xd   : > { %3379 = sst [smem:[#allocation10_spill]] %s2618_s26  ;;  %s38_s29 = sadd.s32 1, %s2614_s25 }
   0xe   : > { %p326_p1 = scmp.ne.s32.totalorder %s2598_s21, %s2594_s20  ;;  %p327_p2 = scmp.eq.s32.totalorder %s2119_s5, 3 }
   0xf   : > { %s3410_s28 = smov (%p36_p0, %s35_s28), 0  ;;  %s3412_s29 = smov (!%p36_p0, %s38_s29), %s2614_s25 }
  0x10   : > { %3380 = sst [smem:[#allocation11_spill]] %s3410_s28  ;;  %s312_s30 = ssub.s32 %s2610_s24, %s3410_s28 }
  0x11   : > { %p2738_p3 = por %p327_p2, %p326_p1  ;;  %p40_p4 = scmp.ge.s32.totalorder %s3412_s29, 2 }
  0x12   : > { %p332_p5 = scmp.ne.s32.totalorder %s2594_s20, %s2590_s19  ;;  %p333_p6 = scmp.eq.s32.totalorder %s2120_s27, 3 }
  0x13   : > { %p2129_p7 = scmp.ge.s32.totalorder %s2618_s26, 1  ;;  %s3414_s29 = smov (%p40_p4, %s3412_s29), 0 }
  0x14   : > { %3382 = sst [smem:[#allocation12_spill]] %s3414_s29  ;;  %p2747_p8 = por %p333_p6, %p332_p5 }
  0x15   : > { %p479_p9 = scmp.lt.s32.totalorder %s2618_s26, 5  ;;  %s311_s14 = ssub.s32 %s2614_s25, %s3414_s29 }
  0x16   : > { %s3383_s13 = scalar_select %p2747_p8, 1, 0 }
  0x17   : > { %s316_s15 = sadd.s32 1, %s2598_s21  ;;  %s313_s16 = sor.u32 %s312_s30, %s311_s14 }
  0x18   : > { %3384 = sst [smem:[#allocation13_spill]] %s3383_s13  ;;  %p480_p10 = pnand %p2129_p7, %p479_p9 }
  0x19   : > { %p314_p11 = scmp.eq.s32.totalorder %s313_s16, 0  ;;  %s2759_s18 = sshll.u32 (!%p480_p10), %s2602_s22, 3  ;;  %vm896_vm0 = vcmask (!%p480_p10), 1047552   ;;  %vm897_vm1 = vsmask.f32 (!%p480_p10), 7424  ;;  %vm1039_vm3 = vcmask (!%p480_p10), 1045504  }
  0x1a   : > { %483 = sbr.rel (%p480_p10) target bundleno = 694 (0x2b6), region = 60  ;;  %p585_p12 = scmp.lt.s32.totalorder (!%p480_p10), %s2606_s23, 1  ;;  %vm2794_vm2 = vmand (!%p480_p10), %vm896_vm0, %vm897_vm1  ;;  %vm853_vm4 = vcmask (!%p480_p10), 1040384   ;;  %vm854_vm5 = vsmask.f32 (!%p480_p10), 256  ;;  %vm959_vm7 = vcmask (!%p480_p10), 31744  }
  0x1b   : > { %s2756_s17 = scalar_select %p314_p11, %s2598_s21, %s316_s15  }
  0x1c   : > { %s2136_s5 = sadd.s32 (!%p480_p10), 4294967295, %s2759_s18  ;;  %p685_p13 = scmp.eq.s32.totalorder (!%p480_p10), %s2602_s22, 0  ;;  %vm2929_vm6 = vmand (!%p480_p10), %vm853_vm4, %vm854_vm5  ;;  %vm990_vm8 = vcmask (!%p480_p10), 64512   ;;  %vm1022_vm9 = vcmask (!%p480_p10), 97280   ;;  %vm1692_vm10 = vcmask (!%p480_p10), 125952   ;;  %vm1724_vm15 = vcmask (!%p480_p10), 130048  }
  0x1d   : > { %3385 = sst [smem:[#allocation14_spill]] %s2756_s17  ;;  %p597_p0 = scmp.gt.s32.totalorder (!%p480_p10), %s2136_s5, 0 }
  0x1e   : > { %p2137_p1 = scmp.lt.s32.totalorder (!%p480_p10), %s2136_s5, 15  ;;  %p587_p4 = scmp.lt.s32.totalorder (!%p480_p10), %s2759_s18, 15 }
  0x1f   : > { %s613_s21 = sadd.s32 (!%p480_p10), 8, %s2759_s18  ;;  %s2621_s13 = smov (!%p480_p10), 8  }
  0x20   : > { %p2790_p5 = scmp.lt.s32.totalorder (!%p480_p10), %s613_s21, 15  ;;  %p705_p6 = scmp.eq.s32.totalorder (!%p480_p10), %s2602_s22, 1 }
  0x21   : > { %s2765_s27 = scalar_select %p585_p12, %s2606_s23, 1 }
  0x22   : > { %s3416_s5 = smov (!%p597_p0, %s2136_s5), 0  ;;  %s3422_s21 = smov (!%p2790_p5, %s613_s21), 15 }
  0x23   : > { %s2768_s30 = sshll.u32 %s2765_s27, 5  ;;  %s3418_s5 = smov (!%p2137_p1, %s3416_s5), 15 }
  0x24   : > { %s686_s14 = scalar_select %p685_p13, 0.0, 1.0 }
  0x25   : > { %s2142_s16 = sshll.u32 %s3418_s5, 1  ;;  %s3424_s21 = smov (!%p2790_p5, %s3422_s21), 15 }
  0x26   : > { %p688_p2 = scmp.ne.f32.partialorder %s686_s14, %s686_s14  ;;  %s689_s15 = sshrl.u32 %s686_s14, 16 }
  0x27   : > { %s690_s29 = sand.u32 1, %s689_s15  ;;  %s605_s28 = sadd.s32 %s2142_s16, %s2768_s30 }
  0x28   : > { %s691_s25 = sadd.s32 32767, %s690_s29  ;;  %s2144_s24 = sshll.u32 %s605_s28, 2 }
  0x29   : > { %s692_s17 = sadd.s32 %s691_s25, %s686_s14  ;;  %s607_s19 = scalar_lea.vmem %s3353_s1, %s2144_s24 }
  0x2a   : > { %s693_s26 = sand.u32 4294901760, %s692_s17  ;;  %v683_v0 = vld [vmem:[%s607_s19] sm:$0xf]  ;;  %v684_v1 = vld [vmem:[%s607_s19 + $0x4] sm:$0xf]  ;;  %s2620_s29 = smov 4  }
  0x2b   : > { %s3420_s26 = smov (%p688_p2, %s693_s26), 2143289344  ;;  %s2437_s17 = smul.u32 24, %s2765_s27 }
  0x2c   : > { %s696_s11 = sshrl.u32 %s3420_s26, 16  ;;  %p634_p9 = scmp.lt.s32.totalorder %s2602_s22, 1 }
  0x2d   : > { %s697_s9 = sshll.u32 %s696_s11, 16 }
  0x2e   : > { %s698_s5 = sor.u32 %s697_s9, %s696_s11 }
  0x2f   : > { %v699_v2 = vstv %s698_s5  ;;  %s588_s15 = scalar_select %p587_p4, %s2759_s18, 15 }
  0x30   : > { %v701_v3 = vmul.bf16 %v699_v2, %v683_v0  ;;  %v702_v4 = vmul.bf16 %v699_v2, %v684_v1  ;;  %s2149_s18 = sshll.u32 %s3424_s21, 1  ;;  %s2840_s5 = scalar_lea.vmem %s3355_s3, %s2437_s17 }
  0x31   : > { %s2132_s28 = sshll.u32 %s588_s15, 1  ;;  %s622_s15 = sadd.s32 %s2149_s18, %s2768_s30  ;;  %v2520_v60 = vld [vmem:[%s2840_s5] sm:$0x3f]   ;;  %v2521_v1 = vld [vmem:[%s2840_s5 + $0x8] sm:$0x3f]  }
  0x32   : > { %v2164_v5 = vcombine.low %v701_v3, %v702_v4  ;;  %s2777_s25 = sadd.s32 %s2768_s30, %s2132_s28  ;;  %s2151_s28 = sshll.u32 %s622_s15, 2  ;;  %2435 = vmatprep.subr.msk.bf16.mxu0 %vm1039_vm3, %v2520_v60  ;;  %v1148_v0 = vsel %vm1039_vm3, %v2520_v60, 0  ;;  %v2522_v4 = vld [vmem:[%s2840_s5 + $0x10] sm:$0x3f]   ;;  %2434 = vmatprep.subr.msk.bf16.mxu1 %vm1039_vm3, %v2521_v1 }
  0x33   : > { %s2134_s24 = sshll.u32 %s2777_s25, 2  ;;  %2349 = vmatpush3.bf16.msra.mxu0 %v1148_v0  ;;  %s624_s18 = scalar_lea.vmem %s3354_s2, %s2151_s28 }
  0x34   : > { %909 = vrot.lane.b32.xlu0 %v2164_v5, %s2620_s29  ;;  %s2787_s11 = scalar_lea.vmem %s3352_s0, %s2134_s24  ;;  %v774_v6 = vshrl.u32 %v2164_v5, 16  ;;  %v777_v7 = vshll.u32 %v2164_v5, 16  ;;  %2436 = vmatprep.subr.msk.bf16.mxu0 %vm1039_vm3, %v2522_v4 }
  0x35   : > { %v2512_v8 = vld [vmem:[%s2787_s11] sm:$0xff]   ;;  %v2513_v12 = vld [vmem:[%s2787_s11 + $0x8] sm:$0xff]   ;;  %v2514_v15 = vld [vmem:[%s2787_s11 + $0x10] sm:$0xff]   ;;  %s2861_s30 = scalar_select %p705_p6, 0.0, 1.0 }
  0x36   : > { %v866_v9 = vrot.slane %v777_v7, 1  ;;  %v776_v11 = vrot.slane %v774_v6, 7  ;;  %v781_v13 = vshrl.u32 %v2512_v8, 16  ;;  %v784_v14 = vshll.u32 %v2512_v8, 16  ;;  %v2515_v21 = vld [vmem:[%s2787_s11 + $0x18] sm:$0xff]   ;;  %v2812_v26 = vld [vmem:[%s2787_s11 + $0x20] sm:$0xff]  }
  0x37   : > { %v788_v19 = vshrl.u32 %v2513_v12, 16  ;;  %v791_v20 = vshll.u32 %v2513_v12, 16  ;;  %v798_v23 = vshll.u32 %v2514_v15, 16  ;;  %v795_v27 = vshrl.u32 %v2514_v15, 16  ;;  %v2818_v33 = vld [vmem:[%s2787_s11 + $0x28] sm:$0xff]   ;;  %v2830_v40 = vld [vmem:[%s2787_s11 + $0x30] sm:$0xff]   ;;  %p708_p7 = scmp.ne.f32.partialorder %s2861_s30, %s2861_s30 }
  0x38   : > { %911 = vrot.lane.b32.xlu0 %v2512_v8, %s2620_s29  ;;  %v867_v16 = vor.u32 %v866_v9, %v774_v6  ;;  %v2801_v17 = vor.u32 %v777_v7, %v776_v11  ;;  %v868_v18 = vrot.slane %v784_v14, 1  ;;  %v805_v29 = vshll.u32 %v2515_v21, 16  ;;  %v2851_v55 = vld [vmem:[%s2787_s11 + $0x38] sm:$0xff]   ;;  %s709_s21 = sshrl.u32 %s2861_s30, 16 }
  0x39   : > { %v870_v25 = vrot.slane %v791_v20, 1  ;;  %v872_v28 = vrot.slane %v798_v23, 1  ;;  %v802_v32 = vshrl.u32 %v2515_v21, 16  ;;  %v783_v34 = vrot.slane %v781_v13, 7  ;;  %s710_s19 = sand.u32 1, %s709_s21  ;;  %s2254_s21 = sshll.u32 %s2602_s22, 4 }
  0x3a   : > { %v899_v22 = vsel %vm2794_vm2, %v867_v16, 0  ;;  %v869_v24 = vor.u32 %v868_v18, %v781_v13  ;;  %v790_v35 = vrot.slane %v788_v19, 7  ;;  %v874_v36 = vrot.slane %v805_v29, 1  ;;  %s711_s9 = sadd.s32 32767, %s710_s19  ;;  %v704_v16 = vld [vmem:[%s624_s18 + $0x4] sm:$0xf] }
  0x3b   : > { %939 = vrot.lane.b32.xlu1 %v899_v22, %s2621_s13  ;;  %v871_v31 = vor.u32 %v870_v25, %v788_v19  ;;  %v809_v38 = vshrl.u32 %v2812_v26, 16  ;;  %v812_v39 = vshll.u32 %v2812_v26, 16  ;;  %v797_v41 = vrot.slane %v795_v27, 7  ;;  %s712_s11 = sadd.s32 %s711_s9, %s2861_s30  ;;  %s2231_s19 = sshll.u32 %s2606_s23, 5 }
  0x3c   : > { %913 = vrot.lane.b32.xlu0 %v2513_v12, %s2620_s29  ;;  %v900_v30 = vsel %vm2794_vm2, %v869_v24, 0  ;;  %v873_v42 = vor.u32 %v872_v28, %v795_v27  ;;  %v804_v43 = vrot.slane %v802_v32, 7  ;;  %v816_v44 = vshrl.u32 %v2818_v33, 16  ;;  %s713_s14 = sand.u32 4294901760, %s712_s11 }
  0x3d   : > { %v901_v37 = vsel %vm2794_vm2, %v871_v31, 0  ;;  %v875_v45 = vor.u32 %v874_v36, %v802_v32  ;;  %v811_v46 = vrot.slane %v809_v38, 7  ;;  %v819_v47 = vshll.u32 %v2818_v33, 16  ;;  %s3426_s14 = smov (%p708_p7, %s713_s14), 2143289344 }
  0x3e   : > { %v823_v48 = vshrl.u32 %v2830_v40, 16  ;;  %v818_v49 = vrot.slane %v816_v44, 7  ;;  %v876_v50 = vrot.slane %v812_v39, 1  ;;  %v2844_v52 = vor.u32 %v784_v14, %v783_v34  ;;  %s716_s16 = sshrl.u32 %s3426_s14, 16 }
  0x3f   : > { %941 = vrot.lane.b32.xlu1 %v900_v30, %s2621_s13  ;;  %v902_v53 = vsel %vm2794_vm2, %v873_v42, 0  ;;  %v826_v54 = vshll.u32 %v2830_v40, 16  ;;  %v2853_v56 = vor.u32 %v791_v20, %v790_v35  ;;  %v2855_v57 = vor.u32 %v798_v23, %v797_v41  ;;  %s717_s5 = sshll.u32 %s716_s16, 16 }
  0x40   : > { %943 = vrot.lane.b32.xlu0 %v901_v37, %s2621_s13  ;;  %v825_v51 = vrot.slane %v823_v48, 7  ;;  %v903_v58 = vsel %vm2794_vm2, %v875_v45, 0  ;;  %v878_v59 = vrot.slane %v819_v47, 1  ;;  %v2864_v61 = vor.u32 %v805_v29, %v804_v43  ;;  %s718_s15 = sor.u32 %s717_s5, %s716_s16  ;;  %s3035_s16 = scalar_lea.vmem %s3359_s7, %s2134_s24 }
  0x41   : > { %v2866_v62 = vor.u32 %v812_v39, %v811_v46  ;;  %v2868_v63 = vor.u32 %v819_v47, %v818_v49  ;;  %v877_v3 = vor.u32 %v876_v50, %v809_v38  ;;  %v833_v6 = vshll.u32 %v2851_v55, 16  ;;  %s635_s30 = scalar_select %p634_p9, %s2602_s22, 1 }
  0x42   : > { %v2875_v2 = vor.u32 %v826_v54, %v825_v51  ;;  %v879_v5 = vor.u32 %v878_v59, %v816_v44  ;;  %v1041_v7 = vsel %vm1039_vm3, %v2521_v1, 0  ;;  %v2887_v8 = vsel %vm1039_vm3, %v2522_v4, 0  ;;  %s2622_s22 = smov [#allocation3]  }
  0x43   : > { %915 = vrot.lane.b32.xlu1 %v2514_v15, %s2620_s29  ;;  %2331 = vmatpush3.bf16.msra.mxu1 %v1041_v7  ;;  %v904_v9 = vsel %vm2794_vm2, %v877_v3, 0  ;;  %v880_v11 = vrot.slane %v826_v54, 1  ;;  %v830_v13 = vshrl.u32 %v2851_v55, 16  ;;  %v882_v14 = vrot.slane %v833_v6, 1  ;;  %v703_v15 = vld [vmem:[%s624_s18] sm:$0xf] }
  0x44   : > { %917 = vrot.lane.b32.xlu0 %v2515_v21, %s2620_s29  ;;  %v905_v12 = vsel %vm2794_vm2, %v879_v5, 0  ;;  %v719_v20 = vstv %s718_s15  ;;  %v1372_v35 = vlaneseq  ;;  %s2153_s28 = sshll.u32 %s635_s30, 3  ;;  %v857_v0 = vsel %vm2929_vm6, 0, %v2844_v52  ;;  %s569_s15 = sand.u32 1, %s2594_s20  }
  0x45   : > { %v881_v18 = vor.u32 %v880_v11, %v823_v48  ;;  %v883_v19 = vor.u32 %v882_v14, %v830_v13  ;;  %v721_v21 = vmul.bf16 %v719_v20, %v703_v15  ;;  %v722_v22 = vmul.bf16 %v719_v20, %v704_v16  ;;  %s637_s9 = scalar_lea.vmem %s3356_s4, %s2153_s28  ;;  %s3122_s30 = sshll.u32 %s569_s15, 6 }
  0x46   : > { %v832_v28 = vrot.slane %v830_v13, 7  ;;  %v1373_v36 = vshrl.u32 %v1372_v35, 7  ;;  %v1371_v39 = vld [vmem:[%s637_s9] sm:$0xff]  ;;  %v858_v3 = vsel %vm2929_vm6, 0, %v2853_v56  ;;  %v859_v13 = vsel %vm2929_vm6, 0, %v2855_v57  ;;  %s3145_s28 = scalar_lea.vmem [#allocation3], %s3122_s30  ;;  %s1886_s9 = sadd.s32 %s2254_s21, %s2231_s19 }
  0x47   : > { %945 = vrot.lane.b32.xlu1 %v902_v53, %s2621_s13  ;;  %v906_v23 = vsel %vm2794_vm2, %v881_v18, 0  ;;  %v2173_v24 = vcombine.low %v721_v21, %v722_v22  ;;  %v907_v25 = vsel %vm2794_vm2, %v883_v19, 0  ;;  %v861_v21 = vsel %vm2929_vm6, 0, %v2866_v62  ;;  %s1889_s11 = sshll.u32 %s3145_s28, 4  ;;  %s3258_s18 = scalar_lea.sflag [#allocation4], %s569_s15  ;;  %s3254_s11 = int_to_ptr.vmem [resolvable:$true] %s1889_s11 }
  0x48   : > { %947 = vrot.lane.b32.xlu0 %v903_v58, %s2621_s13  ;;  %v1374_v37 = vsub.s32 0, %v1373_v36  ;;  %v1385_v38 = vsub.s32 1, %v1373_v36  ;;  %v1396_v41 = vsub.s32 2, %v1373_v36  ;;  %v1407_v43 = vsub.s32 3, %v1373_v36  ;;  %s2524_s14 = scalar_lea.vmem %s3254_s11, 1024  ;;  %s2528_s23 = sshll.u32 %s2622_s22, 4  ;;  %s2529_s23 = int_to_ptr.vmem [resolvable:$false] %s2528_s23 }
  0x49   : > { %v840_v27 = vshll.u32 %v2173_v24, 16  ;;  %v1418_v45 = vsub.s32 4, %v1373_v36  ;;  %v1429_v47 = vsub.s32 5, %v1373_v36  ;;  %v1440_v49 = vsub.s32 6, %v1373_v36  ;;  %p2525_p10 = scmp.ne.s32.totalorder %s3254_s11, %s2524_s14  ;;  %p2531_p13 = scmp.lt.s32.totalorder %s3254_s11, %s2529_s23 }
  0x4a   : > { %v1375_v10 = vrot.slane %v1371_v39, %v1374_v37  ;;  %v1397_v42 = vrot.slane %v1371_v39, %v1396_v41  ;;  %v1408_v44 = vrot.slane %v1371_v39, %v1407_v43  ;;  %v1451_v51 = vsub.s32 7, %v1373_v36 }
  0x4b   : > { %919 = vrot.lane.b32.xlu1 %v2812_v26, %s2620_s29  ;;  %v837_v26 = vshrl.u32 %v2173_v24, 16  ;;  %v884_v30 = vrot.slane %v840_v27, 1  ;;  %v1419_v46 = vrot.slane %v1371_v39, %v1418_v45  ;;  %v1430_v48 = vrot.slane %v1371_v39, %v1429_v47  ;;  %p2526_p11 = pnand %p2525_p10, %p2738_p3 }
  0x4c   : > { %921 = vrot.lane.b32.xlu0 %v2818_v33, %s2620_s29  ;;  %v2919_v33 = vor.u32 %v833_v6, %v832_v28  ;;  %v1441_v50 = vrot.slane %v1371_v39, %v1440_v49  ;;  %v1452_v53 = vrot.slane %v1371_v39, %v1451_v51  ;;  %v856_v58 = vsel %vm2929_vm6, 0, %v2801_v17 }
  0x4d   : > { %v839_v29 = vrot.slane %v837_v26, 7  ;;  %v885_v31 = vor.u32 %v884_v30, %v837_v26  ;;  %p2527_p12 = pneg %p2526_p11 }
  0x4f   : > { %949 = vrot.lane.b32.xlu1 %v904_v9, %s2621_s13  ;;  %v908_v32 = vsel %vm2794_vm2, %v885_v31, 0  ;;  %v2921_v34 = vor.u32 %v840_v27, %v839_v29  ;;  %v863_v29 = vsel %vm2929_vm6, 0, %v2875_v2 }
  0x50   : > { %951 = vrot.lane.b32.xlu0 %v905_v12, %s2621_s13  ;;  %v860_v12 = vsel %vm2929_vm6, 0, %v2864_v61  ;;  %v862_v61 = vsel %vm2929_vm6, 0, %v2868_v63  ;;  %v864_v63 = vsel %vm2929_vm6, 0, %v2919_v33 }
  0x53   : > { %923 = vrot.lane.b32.xlu1 %v2830_v40, %s2620_s29  ;;  %v1386_v40 = vrot.slane %v1371_v39, %v1385_v38  ;;  %v865_v38 = vsel %vm2929_vm6, 0, %v2921_v34 }
  0x54   : > { %925 = vrot.lane.b32.xlu0 %v2851_v55, %s2620_s29 }
  0x57   : > { %953 = vrot.lane.b32.xlu1 %v906_v23, %s2621_s13 }
  0x58   : > { %955 = vrot.lane.b32.xlu0 %v907_v25, %s2621_s13 }
  0x5b   : > { %927 = vrot.lane.b32.xlu1 %v2173_v24, %s2620_s29 }
  0x5c   : > { %1377 = vbcast.lane.b32.xlu0 %v1375_v10, 256 }
  0x5f   : > { %957 = vrot.lane.b32.xlu1 %v908_v32, %s2621_s13  ;;  %s2237_s13 = sshll.u32 %s2765_s27, 3  ;;  %s1370_s27 = sld [smem:[#allocation2]] }
  0x60   : > { %1388 = vbcast.lane.b32.xlu0 %v1386_v40, 256  ;;  %s653_s17 = scalar_lea.vmem %s3360_s8, %s2237_s13  ;;  %s2232_s13 = sshll.u32 %s1886_s9, 6 }
  0x61   : > { %v2523_v41 = vld [vmem:[%s653_s17] sm:$0xff]  }
  0x62   : > { %2384 = vmatprep.subr.bf16.mxu1 %v2523_v41 }
  0x63   : > { %1381 = vbcast.lane.b32.xlu1 %v1375_v10, 264 }
  0x64   : > { %1399 = vbcast.lane.b32.xlu0 %v1397_v42, 256 }
  0x67   : > { %1392 = vbcast.lane.b32.xlu1 %v1386_v40, 264 }
  0x68   : > { %1410 = vbcast.lane.b32.xlu0 %v1408_v44, 256 }
  0x6b   : > { %1403 = vbcast.lane.b32.xlu1 %v1397_v42, 264 }
  0x6c   : > { %1421 = vbcast.lane.b32.xlu0 %v1419_v46, 256 }
  0x6f   : > { %1414 = vbcast.lane.b32.xlu1 %v1408_v44, 264 }
  0x70   : > { %1432 = vbcast.lane.b32.xlu0 %v1430_v48, 256 }
  0x73   : > { %1425 = vbcast.lane.b32.xlu1 %v1419_v46, 264 }
  0x74   : > { %1443 = vbcast.lane.b32.xlu0 %v1441_v50, 256 }
  0x77   : > { %1436 = vbcast.lane.b32.xlu1 %v1430_v48, 264 }
  0x78   : > { %1454 = vbcast.lane.b32.xlu0 %v1452_v53, 256 }
  0x7b   : > { %1447 = vbcast.lane.b32.xlu1 %v1441_v50, 264 }
  0x7f   : > { %1458 = vbcast.lane.b32.xlu1 %v1452_v53, 264 }
  0xa6   : > { %v910_v55 = vpop.permute.xlu0 %909 }
  0xa7   : > { %v962_v60 = vsel %vm959_vm7, %v856_v58, %v910_v55 }
  0xaa   : > { %v912_v59 = vpop.permute.xlu0 %911 }
  0xab   : > { %v965_v6 = vsel %vm959_vm7, %v857_v0, %v912_v59 }
  0xad   : > { %v940_v1 = vpop.permute.xlu1 %939 }
  0xae   : > { %v914_v4 = vpop.permute.xlu0 %913  ;;  %v992_v5 = vsel %vm990_vm8, %v962_v60, %v940_v1 }
  0xaf   : > { %2350 = vmatprep.mubr.msk.bf16.mxu0 %vm1022_vm9, %v992_v5  ;;  %v968_v17 = vsel %vm959_vm7, %v858_v3, %v914_v4 }
  0xb1   : > { %v942_v7 = vpop.permute.xlu1 %941 }
  0xb2   : > { %v944_v9 = vpop.permute.xlu0 %943  ;;  %v994_v11 = vsel %vm990_vm8, %v965_v6, %v942_v7 }
  0xb3   : > { %v996_v52 = vsel %vm990_vm8, %v968_v17, %v944_v9  ;;  %2332 = vmatprep.mubr.msk.bf16.mxu1 %vm1022_vm9, %v994_v11  ;;  %2351 = vmatmul.mubr.msk.bf16.vlgmr.msra.gmra.mrb[0].mxu0 %vm1022_vm9, %v994_v11  ;;  %v1460_v11 = vstv %s1370_s27  ;;  %s3252_s27 = scalar_lea.hbm %s3362_s10, %s2232_s13 }
  0xb4   : > { %2367 = vmatpush3.bf16.msra.mxu0 %v2887_v8  ;;  %2333 = vmatmul.mubr.msk.bf16.vlgmr.msra.gmra.mrb[0].mxu1 %vm1022_vm9, %v996_v52 }
  0xb5   : > { %v916_v56 = vpop.permute.xlu1 %915  ;;  %2354 = vmatprep.mubr.msk.bf16.mxu0 %vm1022_vm9, %v996_v52  ;;  %2385 = vmatpush3.bf16.msra.mxu1 %v2523_v41 }
  0xb6   : > { %v918_v14 = vpop.permute.xlu0 %917  ;;  %v971_v16 = vsel %vm959_vm7, %v859_v13, %v916_v56 }
  0xb7   : > { %v974_v15 = vsel %vm959_vm7, %v860_v12, %v918_v14  ;;  %v3042_v12 = vld [vmem:[%s3035_s16 + $0x8] sm:$0xff]   ;;  %v3047_v14 = vld [vmem:[%s3035_s16] sm:$0xff]  }
  0xb9   : > { %v946_v18 = vpop.permute.xlu1 %945 }
  0xba   : > { %v998_v8 = vsel %vm990_vm8, %v971_v16, %v946_v18  ;;  %v948_v19 = vpop.permute.xlu0 %947 }
  0xbb   : > { %v1000_v20 = vsel %vm990_vm8, %v974_v15, %v948_v19  ;;  %2336 = vmatprep.mubr.msk.bf16.mxu1 %vm1022_vm9, %v998_v8  ;;  %2355 = vmatmul.mubr.msk.bf16.gmra.mrb[4].mxu0 %vm1022_vm9, %v998_v8 }
  0xbc   : > { %2337 = vmatmul.mubr.msk.bf16.gmra.mrb[4].mxu1 %vm1022_vm9, %v1000_v20  ;;  %2358 = vmatprep.mubr.msk.bf16.mxu0 %vm1022_vm9, %v1000_v20 }
  0xbd   : > { %v920_v57 = vpop.permute.xlu1 %919 }
  0xbe   : > { %v922_v22 = vpop.permute.xlu0 %921  ;;  %v977_v24 = vsel %vm959_vm7, %v861_v21, %v920_v57 }
  0xbf   : > { %v980_v23 = vsel %vm959_vm7, %v862_v61, %v922_v22  ;;  %v3059_v22 = vld [vmem:[%s3035_s16 + $0x10] sm:$0xff]  }
  0xc1   : > { %v950_v25 = vpop.permute.xlu1 %949 }
  0xc2   : > { %v1002_v26 = vsel %vm990_vm8, %v977_v24, %v950_v25  ;;  %v952_v27 = vpop.permute.xlu0 %951  ;;  %v2262_v24 = vunpack.c.h.bf16 %v3042_v12 }
  0xc3   : > { %v1004_v28 = vsel %vm990_vm8, %v980_v23, %v952_v27  ;;  %2340 = vmatprep.mubr.msk.bf16.mxu1 %vm1022_vm9, %v1002_v26  ;;  %2359 = vmatmul.mubr.msk.bf16.gmra.mrb[8].mxu0 %vm1022_vm9, %v1002_v26  ;;  %v3062_v23 = vld [vmem:[%s3035_s16 + $0x18] sm:$0xff]   ;;  %v2258_v27 = vunpack.c.h.bf16 %v3047_v14 }
  0xc4   : > { %2341 = vmatmul.mubr.msk.bf16.gmra.mrb[8].mxu1 %vm1022_vm9, %v1004_v28  ;;  %2362 = vmatprep.mubr.msk.bf16.mxu0 %vm1022_vm9, %v1004_v28 }
  0xc5   : > { %v924_v62 = vpop.permute.xlu1 %923 }
  0xc6   : > { %v926_v30 = vpop.permute.xlu0 %925  ;;  %v983_v32 = vsel %vm959_vm7, %v863_v29, %v924_v62 }
  0xc7   : > { %v986_v31 = vsel %vm959_vm7, %v864_v63, %v926_v30 }
  0xc9   : > { %v954_v35 = vpop.permute.xlu1 %953 }
  0xca   : > { %v1006_v36 = vsel %vm990_vm8, %v983_v32, %v954_v35  ;;  %v956_v37 = vpop.permute.xlu0 %955 }
  0xcb   : > { %2344 = vmatprep.mubr.msk.bf16.mxu1 %vm1022_vm9, %v1006_v36  ;;  %2363 = vmatmul.mubr.msk.bf16.gmra.mrb[12].mxu0 %vm1022_vm9, %v1006_v36  ;;  %v1008_v33 = vsel %vm990_vm8, %v986_v31, %v956_v37  ;;  %v2265_v37 = vunpack.c.l.bf16 %v3059_v22 }
  0xcc   : > { %2368 = vmatprep.mubr.msk.bf16.mxu0 %vm1022_vm9, %v996_v52  ;;  %2345 = vmatmul.mubr.msk.bf16.gmra.mrb[12].mxu1 %vm1022_vm9, %v1008_v33 }
  0xcd   : > { %v928_v2 = vpop.permute.xlu1 %927 }
  0xce   : > { %v989_v39 = vsel %vm959_vm7, %v865_v38, %v928_v2  ;;  %v1378_v42 = vpop.permute.xlu0 %1377  ;;  %v2270_v2 = vunpack.c.h.bf16 %v3062_v23  ;;  %v3081_v38 = vld [vmem:[%s3035_s16 + $0x20] sm:$0xff]  }
  0xcf   : > { %v1461_v16 = vmul.f32 %v1460_v11, %v1378_v42 }
  0xd1   : > { %v958_v10 = vpop.permute.xlu1 %957 }
  0xd2   : > { %v1010_v40 = vsel %vm990_vm8, %v989_v39, %v958_v10  ;;  %v1389_v34 = vpop.permute.xlu0 %1388  ;;  %v3084_v39 = vld [vmem:[%s3035_s16 + $0x28] sm:$0xff]   ;;  %v3089_v10 = vld [vmem:[%s3358_s6] ss:$0 sm:$0xff] }
  0xd3   : > { %2369 = vmatmul.mubr.msk.bf16.vlgmr.msra.gmra.mrb[0].mxu0 %vm1022_vm9, %v998_v8  ;;  %v1463_v8 = vmul.f32 %v1460_v11, %v1389_v34  ;;  %v2266_v34 = vunpack.c.h.bf16 %v3059_v22 }
  0xd4   : > { %2372 = vmatprep.mubr.msk.bf16.mxu0 %vm1022_vm9, %v1000_v20  ;;  %v2261_v20 = vunpack.c.l.bf16 %v3042_v12 }
  0xd5   : > { %v1382_v43 = vpop.permute.xlu1 %1381 }
  0xd6   : > { %v1400_v46 = vpop.permute.xlu0 %1399  ;;  %v1462_v18 = vmul.f32 %v1460_v11, %v1382_v43 }
  0xd7   : > { %v3052_v57 = vmul.f32 %v1460_v11, %v1400_v46 }
  0xd9   : > { %v1393_v44 = vpop.permute.xlu1 %1392 }
  0xda   : > { %v1411_v51 = vpop.permute.xlu0 %1410  ;;  %v1464_v19 = vmul.f32 %v1460_v11, %v1393_v44 }
  0xdb   : > { %2373 = vmatmul.mubr.msk.bf16.gmra.mrb[4].mxu0 %vm1022_vm9, %v1002_v26  ;;  %v3056_v21 = vmul.f32 %v1460_v11, %v1411_v51  ;;  %v2257_v26 = vunpack.c.l.bf16 %v3047_v14 }
  0xdc   : > { %2376 = vmatprep.mubr.msk.bf16.mxu0 %vm1022_vm9, %v1004_v28 }
  0xdd   : > { %v1404_v48 = vpop.permute.xlu1 %1403 }
  0xde   : > { %v1422_v60 = vpop.permute.xlu0 %1421  ;;  %v3054_v61 = vmul.f32 %v1460_v11, %v1404_v48 }
  0xdf   : > { %v3069_v63 = vmul.f32 %v1460_v11, %v1422_v60  ;;  %v3104_v60 = vld [vmem:[%s3035_s16 + $0x38] sm:$0xff]  }
  0xe1   : > { %v1415_v53 = vpop.permute.xlu1 %1414 }
  0xe2   : > { %v1433_v5 = vpop.permute.xlu0 %1432  ;;  %v3065_v25 = vmul.f32 %v1460_v11, %v1415_v53  ;;  %v3101_v53 = vld [vmem:[%s3035_s16 + $0x30] sm:$0xff]   ;;  %s2530_s16 = scalar_lea.vmem %s2529_s23, 2048 }
  0xe3   : > { %2377 = vmatmul.mubr.msk.bf16.gmra.mrb[8].mxu0 %vm1022_vm9, %v1006_v36  ;;  %v3073_v30 = vmul.f32 %v1460_v11, %v1433_v5  ;;  %v2273_v5 = vunpack.c.l.bf16 %v3081_v38  ;;  %p2532_p0 = scmp.lt.s32.totalorder %s2530_s16, %s2524_s14 }
  0xe4   : > { %2380 = vmatprep.mubr.msk.bf16.mxu0 %vm1022_vm9, %v1008_v33  ;;  %v2269_v33 = vunpack.c.l.bf16 %v3062_v23 }
  0xe5   : > { %v1426_v0 = vpop.permute.xlu1 %1425  ;;  %p2533_p1 = por %p2532_p0, %p2531_p13 }
  0xe6   : > { %v1444_v9 = vpop.permute.xlu0 %1443  ;;  %v3071_v29 = vmul.f32 %v1460_v11, %v1426_v0 }
  0xe7   : > { %v3091_v42 = vmul.f32 %v1460_v11, %v1444_v9  ;;  %p2534_p2 = pnand %p2533_p1, %p2527_p12 }
  0xe9   : > { %v1437_v17 = vpop.permute.xlu1 %1436 }
  0xea   : > { %v1455_v28 = vpop.permute.xlu0 %1454  ;;  %v3075_v31 = vmul.f32 %v1460_v11, %v1437_v17  ;;  %v2277_v17 = vunpack.c.l.bf16 %v3084_v39 }
  0xeb   : > { %2381 = vmatmul.mubr.msk.bf16.gmra.mrb[12].mxu0 %vm1022_vm9, %v1010_v40  ;;  %v3096_v48 = vmul.f32 %v1460_v11, %v1455_v28 }
  0xed   : > { %v1448_v56 = vpop.permute.xlu1 %1447 }
  0xee   : > { %v3093_v43 = vmul.f32 %v1460_v11, %v1448_v56  ;;  %v2274_v56 = vunpack.c.h.bf16 %v3081_v38 }
  0xf1   : > { %v1459_v32 = vpop.permute.xlu1 %1458 }
  0xf2   : > { %v3098_v51 = vmul.f32 %v1460_v11, %v1459_v32 }
 0x187   : > { %v2334_v45 = vpop.f32.mrb[0].mxu1 }
 0x188   : > { %v1077_v47 = vpop.f32.mrb[1].mxu1 }
 0x189   : > { %v2335_v49 = vpop.f32.mrb[2].mxu1 }
 0x18a   : > { %v3012_v50 = vpop.f32.mrb[3].mxu1 }
 0x18f   : > { %v3014_v54 = vpop.f32.mrb[4].mxu1 }
 0x190   : > { %v3016_v55 = vpop.f32.mrb[5].mxu1 }
 0x191   : > { %v3018_v58 = vpop.f32.mrb[6].mxu1 }
 0x192   : > { %v3020_v59 = vpop.f32.mrb[7].mxu1 }
 0x197   : > { %v3022_v1 = vpop.f32.mrb[8].mxu1 }
 0x198   : > { %v3024_v3 = vpop.f32.mrb[9].mxu1 }
 0x199   : > { %v3026_v4 = vpop.f32.mrb[10].mxu1 }
 0x19a   : > { %v3028_v6 = vpop.f32.mrb[11].mxu1 }
 0x19f   : > { %v3037_v7 = vpop.f32.mrb[12].mxu1 }
 0x1a0   : > { %v3039_v52 = vpop.f32.mrb[13].mxu1 }
 0x1a1   : > { %v3044_v13 = vpop.f32.mrb[14].mxu1 }
 0x1a2   : > { %v3049_v15 = vpop.f32.mrb[15].mxu1 }
 0x1a6   : > { %v2370_v62 = vpop.f32.mrb[0].mxu0 }
 0x1a7   : > { %v2402_v35 = vadd.f32 %v2370_v62, %v2334_v45  ;;  %v1291_v36 = vpop.f32.mrb[1].mxu0 }
 0x1a8   : > { %v2403_v40 = vadd.f32 %v1291_v36, %v1077_v47  ;;  %v2371_v41 = vpop.f32.mrb[2].mxu0 }
 0x1a9   : > { %v1479_v44 = vadd.f32 %v2402_v35, %v1463_v8  ;;  %v2404_v45 = vadd.f32 %v2371_v41, %v2335_v49  ;;  %v1294_v46 = vpop.f32.mrb[3].mxu0 }
 0x1aa   : > { %v1477_v47 = vadd.f32 %v2403_v40, %v1461_v16  ;;  %v2405_v0 = vadd.f32 %v1294_v46, %v3012_v50 }
 0x1ab   : > { %v1502_v9 = vadd.f32 %v3089_v10, %v1479_v44  ;;  %v1480_v49 = vadd.f32 %v2404_v45, %v1464_v19 }
 0x1ac   : > { %v1500_v8 = vadd.f32 %v3089_v10, %v1477_v47  ;;  %v1478_v28 = vadd.f32 %v2405_v0, %v1462_v18 }
 0x1ad   : > { %vm1518_vm11 = vcmp.ge.f32.partialorder %v1502_v9, 0.0  ;;  %v1534_v62 = vmul.f32 0.2, %v1502_v9  ;;  %v1503_v32 = vadd.f32 %v3089_v10, %v1480_v49 }
 0x1ae   : > { %vm1516_vm12 = vcmp.ge.f32.partialorder %v1500_v8, 0.0  ;;  %v1532_v19 = vmul.f32 0.2, %v1500_v8  ;;  %v1501_v36 = vadd.f32 %v3089_v10, %v1478_v28  ;;  %v2374_v40 = vpop.f32.mrb[4].mxu0 }
 0x1af   : > { %v1550_v18 = vsel %vm1518_vm11, %v1502_v9, %v1534_v62  ;;  %vm1519_vm13 = vcmp.ge.f32.partialorder %v1503_v32, 0.0  ;;  %v1535_v44 = vmul.f32 0.2, %v1503_v32  ;;  %v2406_v45 = vadd.f32 %v2374_v40, %v3014_v54  ;;  %v1307_v46 = vpop.f32.mrb[5].mxu0 }
 0x1b0   : > { %v1566_v47 = vmul.f32 1.4142135, %v1550_v18  ;;  %v1548_v0 = vsel %vm1516_vm12, %v1500_v8, %v1532_v19  ;;  %vm1517_vm14 = vcmp.ge.f32.partialorder %v1501_v36, 0.0  ;;  %v1533_v49 = vmul.f32 0.2, %v1501_v36  ;;  %v2375_v35 = vpop.f32.mrb[6].mxu0 }
 0x1b1   : > { %v1564_v50 = vmul.f32 1.4142135, %v1548_v0  ;;  %v1551_v16 = vsel %vm1519_vm13, %v1503_v32, %v1535_v44  ;;  %v1483_v28 = vadd.f32 %v2406_v45, %v3056_v21  ;;  %v2407_v41 = vadd.f32 %v1307_v46, %v3016_v55  ;;  %v1310_v11 = vpop.f32.mrb[7].mxu0 }
 0x1b2   : > { %v3129_v9 = vadd.f32 %v2261_v20, %v1566_v47  ;;  %v1567_v62 = vmul.f32 1.4142135, %v1551_v16  ;;  %v1549_v54 = vsel %vm1517_vm14, %v1501_v36, %v1533_v49  ;;  %v2408_v40 = vadd.f32 %v2375_v35, %v3018_v58 }
 0x1b3   : > { %v1565_v8 = vmul.f32 1.4142135, %v1549_v54  ;;  %v1506_v19 = vadd.f32 %v3089_v10, %v1483_v28  ;;  %v1481_v18 = vadd.f32 %v2407_v41, %v3052_v57  ;;  %v2409_v32 = vadd.f32 %v1310_v11, %v3020_v59 }
 0x1b4   : > { %v2240_v55 = vpack.c.bf16 %v3129_v9, %v3129_v9  ;;  %v1615_v20 = vadd.f32 %v2262_v24, %v1567_v62  ;;  %v1484_v21 = vadd.f32 %v2408_v40, %v3065_v25  ;;  %v1612_v16 = vadd.f32 %v2257_v26, %v1564_v50 }
 0x1b5   : > { %vm1522_vm0 = vcmp.ge.f32.partialorder %v1506_v19, 0.0  ;;  %v1538_v58 = vmul.f32 0.2, %v1506_v19  ;;  %v1504_v35 = vadd.f32 %v3089_v10, %v1481_v18  ;;  %v1482_v57 = vadd.f32 %v2409_v32, %v3054_v61 }
 0x1b6   : > { %1695 = vst.msk [vmem:[%s3145_s28 + $0x8] sm:$0xf] %vm1692_vm10, %v2240_v55  ;;  %v1629_v59 = vpack.c.bf16 %v1615_v20, %v3129_v9  ;;  %v2241_v12 = vpack.c.bf16 %v1615_v20, %v1615_v20  ;;  %v1507_v24 = vadd.f32 %v3089_v10, %v1484_v21  ;;  %v2378_v25 = vpop.f32.mrb[8].mxu0  ;;  %v1613_v26 = vadd.f32 %v2258_v27, %v1565_v8 }
 0x1b7   : > { %v1554_v11 = vsel %vm1522_vm0, %v1506_v19, %v1538_v58  ;;  %vm1520_vm1 = vcmp.ge.f32.partialorder %v1504_v35, 0.0  ;;  %v1536_v50 = vmul.f32 0.2, %v1504_v35  ;;  %v1505_v61 = vadd.f32 %v3089_v10, %v1482_v57  ;;  %v1323_v36 = vpop.f32.mrb[9].mxu0 }
 0x1b8   : > { %1696 = vst.msk [vmem:[%s3145_s28 + $0xc] sm:$0xf] %vm1692_vm10, %v2241_v12  ;;  %v3156_v41 = vmul.f32 1.4142135, %v1554_v11  ;;  %vm1523_vm2 = vcmp.ge.f32.partialorder %v1507_v24, 0.0  ;;  %v2410_v45 = vadd.f32 %v2378_v25, %v3022_v1  ;;  %v2379_v46 = vpop.f32.mrb[10].mxu0  ;;  %v2411_v14 = vadd.f32 %v1323_v36, %v3024_v3 }
 0x1b9   : > { %v1539_v44 = vmul.f32 0.2, %v1507_v24  ;;  %v1552_v47 = vsel %vm1520_vm1, %v1504_v35, %v1536_v50  ;;  %vm1521_vm3 = vcmp.ge.f32.partialorder %v1505_v61, 0.0  ;;  %v1537_v0 = vmul.f32 0.2, %v1505_v61  ;;  %v1326_v27 = vpop.f32.mrb[11].mxu0 }
 0x1ba   : > { %v1568_v49 = vmul.f32 1.4142135, %v1552_v47  ;;  %v1487_v9 = vadd.f32 %v2410_v45, %v3073_v30  ;;  %v2412_v62 = vadd.f32 %v2379_v46, %v3026_v4  ;;  %v1485_v8 = vadd.f32 %v2411_v14, %v3069_v63 }
 0x1bb   : > { %v1555_v28 = vsel %vm1523_vm2, %v1507_v24, %v1539_v44  ;;  %v1553_v40 = vsel %vm1521_vm3, %v1505_v61, %v1537_v0  ;;  %v2413_v1 = vadd.f32 %v1326_v27, %v3028_v6  ;;  %v1628_v32 = vpack.c.bf16 %v1613_v26, %v1612_v16 }
 0x1bc   : > { %v3162_v54 = vmul.f32 1.4142135, %v1555_v28  ;;  %v1569_v19 = vmul.f32 1.4142135, %v1553_v40  ;;  %v1510_v18 = vadd.f32 %v3089_v10, %v1487_v9  ;;  %v1488_v3 = vadd.f32 %v2412_v62, %v3075_v31 }
 0x1bd   : > { %v1508_v55 = vadd.f32 %v3089_v10, %v1485_v8  ;;  %v1486_v30 = vadd.f32 %v2413_v1, %v3071_v29  ;;  %v2238_v4 = vpack.c.bf16 %v1612_v16, %v1612_v16  ;;  %v2239_v20 = vpack.c.bf16 %v1613_v26, %v1613_v26  ;;  %2386 = vmatprep.mubr.msk.bf16.mxu1 %vm1724_vm15, %v1628_v32 }
 0x1be   : > { %vm1526_vm4 = vcmp.ge.f32.partialorder %v1510_v18, 0.0  ;;  %v1542_v21 = vmul.f32 0.2, %v1510_v18  ;;  %v1511_v63 = vadd.f32 %v3089_v10, %v1488_v3  ;;  %v2382_v6 = vpop.f32.mrb[12].mxu0  ;;  %v1616_v58 = vadd.f32 %v2265_v37, %v1568_v49  ;;  %2387 = vmatmul.mubr.msk.bf16.vlgmr.msra.gmra.mrb[16].mxu1 %vm1724_vm15, %v1629_v59 }
 0x1bf   : > { %vm1524_vm5 = vcmp.ge.f32.partialorder %v1508_v55, 0.0  ;;  %v1540_v31 = vmul.f32 0.2, %v1508_v55  ;;  %v1509_v35 = vadd.f32 %v3089_v10, %v1486_v30  ;;  %1693 = vst.msk [vmem:[%s3145_s28] sm:$0xf] %vm1692_vm10, %v2238_v4  ;;  %v2414_v29 = vadd.f32 %v2382_v6, %v3037_v7  ;;  %v1339_v16 = vpop.f32.mrb[13].mxu0 }
 0x1c0   : > { %1694 = vst.msk [vmem:[%s3145_s28 + $0x4] sm:$0xf] %vm1692_vm10, %v2239_v20  ;;  %v1558_v57 = vsel %vm1526_vm4, %v1510_v18, %v1542_v21  ;;  %vm1527_vm6 = vcmp.ge.f32.partialorder %v1511_v63, 0.0  ;;  %v1543_v12 = vmul.f32 0.2, %v1511_v63  ;;  %v2415_v24 = vadd.f32 %v1339_v16, %v3039_v52  ;;  %v2383_v25 = vpop.f32.mrb[14].mxu0 }
 0x1c1   : > { %v1574_v37 = vmul.f32 1.4142135, %v1558_v57  ;;  %v1556_v26 = vsel %vm1524_vm5, %v1508_v55, %v1540_v31  ;;  %vm1525_vm7 = vcmp.ge.f32.partialorder %v1509_v35, 0.0  ;;  %v1541_v11 = vmul.f32 0.2, %v1509_v35  ;;  %v1342_v50 = vpop.f32.mrb[15].mxu0 }
 0x1c2   : > { %v1572_v61 = vmul.f32 1.4142135, %v1556_v26  ;;  %v1559_v36 = vsel %vm1527_vm6, %v1511_v63, %v1543_v12  ;;  %v1491_v44 = vadd.f32 %v2414_v29, %v3096_v48  ;;  %v1489_v59 = vadd.f32 %v2415_v24, %v3091_v42 }
 0x1c3   : > { %v1575_v45 = vmul.f32 1.4142135, %v1559_v36  ;;  %v1557_v7 = vsel %vm1525_vm7, %v1509_v35, %v1541_v11  ;;  %v2416_v46 = vadd.f32 %v2383_v25, %v3044_v13  ;;  %v2417_v47 = vadd.f32 %v1342_v50, %v3049_v15 }
 0x1c4   : > { %v1573_v0 = vmul.f32 1.4142135, %v1557_v7  ;;  %v1514_v52 = vadd.f32 %v3089_v10, %v1491_v44  ;;  %v1512_v14 = vadd.f32 %v3089_v10, %v1489_v59  ;;  %v1617_v27 = vadd.f32 %v2266_v34, %v1569_v19 }
 0x1c5   : > { %v1492_v49 = vadd.f32 %v2416_v46, %v3098_v51  ;;  %v1490_v48 = vadd.f32 %v2417_v47, %v3093_v43  ;;  %v2242_v42 = vpack.c.bf16 %v1616_v58, %v1616_v58  ;;  %v1618_v13 = vadd.f32 %v2269_v33, %v3156_v41 }
 0x1c6   : > { %vm1530_vm8 = vcmp.ge.f32.partialorder %v1514_v52, 0.0  ;;  %v1546_v15 = vmul.f32 0.2, %v1514_v52  ;;  %vm1528_vm11 = vcmp.ge.f32.partialorder %v1512_v14, 0.0  ;;  %v1544_v28 = vmul.f32 0.2, %v1512_v14 }
 0x1c7   : > { %v1515_v9 = vadd.f32 %v3089_v10, %v1492_v49  ;;  %v1513_v62 = vadd.f32 %v3089_v10, %v1490_v48  ;;  %v1630_v22 = vpack.c.bf16 %v1617_v27, %v1616_v58  ;;  %v2243_v34 = vpack.c.bf16 %v1617_v27, %v1617_v27  ;;  %1697 = vst.msk [vmem:[%s3145_s28 + $0x10] sm:$0xf] %vm1692_vm10, %v2242_v42 }
 0x1c8   : > { %v1562_v43 = vsel %vm1530_vm8, %v1514_v52, %v1546_v15  ;;  %v1560_v51 = vsel %vm1528_vm11, %v1512_v14, %v1544_v28  ;;  %v1619_v33 = vadd.f32 %v2270_v2, %v3162_v54  ;;  %v2244_v41 = vpack.c.bf16 %v1618_v13, %v1618_v13 }
 0x1c9   : > { %v1578_v40 = vmul.f32 1.4142135, %v1562_v43  ;;  %v1576_v8 = vmul.f32 1.4142135, %v1560_v51  ;;  %vm1531_vm12 = vcmp.ge.f32.partialorder %v1515_v9, 0.0  ;;  %vm1529_vm13 = vcmp.ge.f32.partialorder %v1513_v62, 0.0  ;;  %2390 = vmatprep.mubr.msk.bf16.mxu1 %vm1724_vm15, %v1630_v22 }
 0x1ca   : > { %1698 = vst.msk [vmem:[%s3145_s28 + $0x14] sm:$0xf] %vm1692_vm10, %v2243_v34  ;;  %v1547_v10 = vmul.f32 0.2, %v1515_v9  ;;  %v1545_v1 = vmul.f32 0.2, %v1513_v62  ;;  %v1631_v19 = vpack.c.bf16 %v1619_v33, %v1618_v13  ;;  %v2245_v18 = vpack.c.bf16 %v1619_v33, %v1619_v33 }
 0x1cb   : > { %1699 = vst.msk [vmem:[%s3145_s28 + $0x18] sm:$0xf] %vm1692_vm10, %v2244_v41  ;;  %v1620_v23 = vadd.f32 %v2273_v5, %v1572_v61  ;;  %v1621_v2 = vadd.f32 %v2274_v56, %v1573_v0  ;;  %v1622_v54 = vadd.f32 %v2277_v17, %v1574_v37  ;;  %v3391_v3 = vunpack.c.h.bf16 %v3084_v39 }
 0x1cc   : > { %v1563_v55 = vsel %vm1531_vm12, %v1515_v9, %v1547_v10  ;;  %v1561_v30 = vsel %vm1529_vm13, %v1513_v62, %v1545_v1  ;;  %1700 = vst.msk [vmem:[%s3145_s28 + $0x1c] sm:$0xf] %vm1692_vm10, %v2245_v18  ;;  %2391 = vmatmul.mubr.msk.bf16.gmra.mrb[20].mxu1 %vm1724_vm15, %v1631_v19  ;;  %v3392_v4 = vunpack.c.l.bf16 %v3101_v53  ;;  %v3393_v5 = vunpack.c.l.bf16 %v3104_v60 }
 0x1cd   : > { %v1623_v32 = vadd.f32 %v3391_v3, %v1575_v45  ;;  %v1579_v56 = vmul.f32 1.4142135, %v1563_v55  ;;  %v1577_v17 = vmul.f32 1.4142135, %v1561_v30  ;;  %v1632_v39 = vpack.c.bf16 %v1621_v2, %v1620_v23 }
 0x1ce   : > { %v1624_v20 = vadd.f32 %v3392_v4, %v1576_v8  ;;  %v1626_v38 = vadd.f32 %v3393_v5, %v1578_v40  ;;  %v2246_v21 = vpack.c.bf16 %v1620_v23, %v1620_v23  ;;  %v2247_v63 = vpack.c.bf16 %v1621_v2, %v1621_v2 }
 0x1cf   : > { %v1633_v6 = vpack.c.bf16 %v1623_v32, %v1622_v54  ;;  %v2248_v58 = vpack.c.bf16 %v1622_v54, %v1622_v54  ;;  %v2249_v31 = vpack.c.bf16 %v1623_v32, %v1623_v32  ;;  %2394 = vmatprep.mubr.msk.bf16.mxu1 %vm1724_vm15, %v1632_v39  ;;  %v3394_v35 = vunpack.c.h.bf16 %v3101_v53 }
 0x1d0   : > { %1701 = vst.msk [vmem:[%s3145_s28 + $0x20] sm:$0xf] %vm1692_vm10, %v2246_v21  ;;  %v2250_v16 = vpack.c.bf16 %v1624_v20, %v1624_v20  ;;  %v3395_v57 = vunpack.c.h.bf16 %v3104_v60  ;;  %v2252_v24 = vpack.c.bf16 %v1626_v38, %v1626_v38  ;;  %1702 = vst.msk [vmem:[%s3145_s28 + $0x24] sm:$0xf] %vm1692_vm10, %v2247_v63 }
 0x1d1   : > { %v1625_v29 = vadd.f32 %v3394_v35, %v1577_v17  ;;  %1703 = vst.msk [vmem:[%s3145_s28 + $0x28] sm:$0xf] %vm1692_vm10, %v2248_v58  ;;  %1704 = vst.msk [vmem:[%s3145_s28 + $0x2c] sm:$0xf] %vm1692_vm10, %v2249_v31 }
 0x1d2   : > { %v1627_v12 = vadd.f32 %v3395_v57, %v1579_v56  ;;  %1705 = vst.msk [vmem:[%s3145_s28 + $0x30] sm:$0xf] %vm1692_vm10, %v2250_v16  ;;  %1707 = vst.msk [vmem:[%s3145_s28 + $0x38] sm:$0xf] %vm1692_vm10, %v2252_v24 }
 0x1d3   : > { %v1634_v25 = vpack.c.bf16 %v1625_v29, %v1624_v20  ;;  %v2251_v37 = vpack.c.bf16 %v1625_v29, %v1625_v29 }
 0x1d4   : > { %v1635_v53 = vpack.c.bf16 %v1627_v12, %v1626_v38  ;;  %v2253_v26 = vpack.c.bf16 %v1627_v12, %v1627_v12  ;;  %2395 = vmatmul.mubr.msk.bf16.gmra.mrb[24].mxu1 %vm1724_vm15, %v1633_v6 }
 0x1d5   : > { %1706 = vst.msk [vmem:[%s3145_s28 + $0x34] sm:$0xf] %vm1692_vm10, %v2251_v37  ;;  %2398 = vmatprep.mubr.msk.bf16.mxu1 %vm1724_vm15, %v1634_v25 }
 0x1d6   : > { %1708 = vst.msk [vmem:[%s3145_s28 + $0x3c] sm:$0xf] %vm1692_vm10, %v2253_v26 }
 0x1dc   : > { %2399 = vmatmul.mubr.msk.bf16.gmra.mrb[28].mxu1 %vm1724_vm15, %v1635_v53 }
 0x1dd   : > { %2537 = shalt.err (!%p2534_p2)
}
 0x1de   : > { %s2538_s24 = scalar_lea.hbm %s3252_s27, 1024  ;;  %s2542_s30 = scalar_lea.hbm %s3362_s10, 4096 }
 0x1df   : > { %p2539_p4 = scmp.ne.s32.totalorder %s3252_s27, %s2538_s24  ;;  %p2543_p7 = scmp.lt.u32.totalorder %s3252_s27, %s3362_s10 }
 0x1e0   : > { %p2544_p9 = scmp.lt.u32.totalorder %s2542_s30, %s2538_s24  ;;  %p2546_p11 = scmp.lt.u32.totalorder %s2538_s24, %s3252_s27 }
 0x1e1   : > { %p2540_p5 = pnand %p2539_p4, %p2738_p3 }
 0x1e2   : > { %p2545_p10 = por %p2544_p9, %p2543_p7 }
 0x1e3   : > { %p2541_p6 = pneg %p2540_p5 }
 0x1e4   : > { %p2547_p12 = por %p2546_p11, %p2545_p10 }
 0x1e6   : > { %p2548_p13 = pnand %p2547_p12, %p2541_p6 }
 0x1e8   : > { %2551 = shalt.err (!%p2548_p13)
}
 0x1e9   : > { %s2623_s19 = smov 64   ;;  %s2163_s9 = sshll.u32 %s2777_s25, 3 }
 0x1ea   : > { %2438 = dma.vmem_to_hbm [thread:$0]  (%p2738_p3), %s3254_s11, 1024, %s3252_s27, %s3258_s18, %s2623_s19, %s2623_s19, %s2620_s29  }
 0x1eb   : > { %s3396_s17 = sld [smem:[#allocation15_spill]]  ;;  %s3397_s23 = sld [smem:[#allocation16_spill]] }
 0x1f1   : > { %v2218_v60 = vld [vmem:[%s3396_s17] ss:$0 sm:$0xff]  ;;  %s3290_s16 = scalar_lea.vmem %s3397_s23, %s2163_s9 }
 0x291   : > { %v2388_v11 = vpop.f32.mrb[16].mxu1 }
 0x292   : > { %v1792_v50 = vadd.f32 %v2388_v11, %v2218_v60  ;;  %v1783_v61 = vpop.f32.mrb[17].mxu1 }
 0x293   : > { %v1784_v36 = vadd.f32 %v2218_v60, %v1783_v61  ;;  %v2389_v44 = vpop.f32.mrb[18].mxu1 }
 0x294   : > { %1848 = vst.msk [vmem:[%s3290_s16 + $0x10] sm:$0xff] %vm1022_vm9, %v1792_v50  ;;  %v1795_v59 = vadd.f32 %v2389_v44, %v2218_v60  ;;  %v1786_v45 = vpop.f32.mrb[19].mxu1 }
 0x295   : > { %1846 = vst.msk [vmem:[%s3290_s16] sm:$0xff] %vm1022_vm9, %v1784_v36  ;;  %v1787_v7 = vadd.f32 %v2218_v60, %v1786_v45 }
 0x296   : > { %1849 = vst.msk [vmem:[%s3290_s16 + $0x18] sm:$0xff] %vm1022_vm9, %v1795_v59 }
 0x297   : > { %1847 = vst.msk [vmem:[%s3290_s16 + $0x8] sm:$0xff] %vm1022_vm9, %v1787_v7 }
 0x29f   : > { %v2392_v46 = vpop.f32.mrb[20].mxu1 }
 0x2a0   : > { %v1808_v47 = vadd.f32 %v2392_v46, %v2218_v60  ;;  %v1799_v0 = vpop.f32.mrb[21].mxu1 }
 0x2a1   : > { %v1800_v52 = vadd.f32 %v2218_v60, %v1799_v0  ;;  %v2393_v14 = vpop.f32.mrb[22].mxu1 }
 0x2a2   : > { %1852 = vst.msk [vmem:[%s3290_s16 + $0x30] sm:$0xff] %vm1022_vm9, %v1808_v47  ;;  %v1811_v27 = vadd.f32 %v2393_v14, %v2218_v60  ;;  %v1802_v49 = vpop.f32.mrb[23].mxu1 }
 0x2a3   : > { %1850 = vst.msk [vmem:[%s3290_s16 + $0x20] sm:$0xff] %vm1022_vm9, %v1800_v52  ;;  %v1803_v48 = vadd.f32 %v2218_v60, %v1802_v49 }
 0x2a4   : > { %1853 = vst.msk [vmem:[%s3290_s16 + $0x38] sm:$0xff] %vm1022_vm9, %v1811_v27 }
 0x2a5   : > { %1851 = vst.msk [vmem:[%s3290_s16 + $0x28] sm:$0xff] %vm1022_vm9, %v1803_v48 }
 0x2a7   : > { %v2396_v42 = vpop.f32.mrb[24].mxu1 }
 0x2a8   : > { %v1824_v13 = vadd.f32 %v2396_v42, %v2218_v60  ;;  %v1815_v15 = vpop.f32.mrb[25].mxu1 }
 0x2a9   : > { %v1816_v28 = vadd.f32 %v2218_v60, %v1815_v15  ;;  %v2397_v9 = vpop.f32.mrb[26].mxu1 }
 0x2aa   : > { %1856 = vst.msk [vmem:[%s3290_s16 + $0x50] sm:$0xff] %vm1022_vm9, %v1824_v13  ;;  %v1827_v62 = vadd.f32 %v2397_v9, %v2218_v60  ;;  %v1818_v22 = vpop.f32.mrb[27].mxu1 }
 0x2ab   : > { %1854 = vst.msk [vmem:[%s3290_s16 + $0x40] sm:$0xff] %vm1022_vm9, %v1816_v28  ;;  %v1819_v34 = vadd.f32 %v2218_v60, %v1818_v22 }
 0x2ac   : > { %1857 = vst.msk [vmem:[%s3290_s16 + $0x58] sm:$0xff] %vm1022_vm9, %v1827_v62 }
 0x2ad   : > { %1855 = vst.msk [vmem:[%s3290_s16 + $0x48] sm:$0xff] %vm1022_vm9, %v1819_v34 }
 0x2af   : > { %v2400_v43 = vpop.f32.mrb[28].mxu1 }
 0x2b0   : > { %v1840_v51 = vadd.f32 %v2400_v43, %v2218_v60  ;;  %v1831_v33 = vpop.f32.mrb[29].mxu1 }
 0x2b1   : > { %v1832_v41 = vadd.f32 %v2218_v60, %v1831_v33  ;;  %v2401_v40 = vpop.f32.mrb[30].mxu1 }
 0x2b2   : > { %1860 = vst.msk [vmem:[%s3290_s16 + $0x70] sm:$0xff] %vm1022_vm9, %v1840_v51  ;;  %v1843_v8 = vadd.f32 %v2401_v40, %v2218_v60  ;;  %v1834_v10 = vpop.f32.mrb[31].mxu1 }
 0x2b3   : > { %1858 = vst.msk [vmem:[%s3290_s16 + $0x60] sm:$0xff] %vm1022_vm9, %v1832_v41  ;;  %v1835_v1 = vadd.f32 %v2218_v60, %v1834_v10 }
 0x2b4   : > { %1861 = vst.msk [vmem:[%s3290_s16 + $0x78] sm:$0xff] %vm1022_vm9, %v1843_v8 }
 0x2b5   : > { %1859 = vst.msk [vmem:[%s3290_s16 + $0x68] sm:$0xff] %vm1022_vm9, %v1835_v1 }
 0x2b6 PF: > { %s3398_s12 = sld [smem:[#allocation10_spill]]  ;;  %s3399_s25 = sld [smem:[#allocation6_spill]] }
 0x2bc   : > { %p2444_p3 = scmp.ge.s32.totalorder %s3398_s12, 2  ;;  %s1908_s11 = sand.u32 1, %s3399_s25  }
 0x2bd   : > { %s1909_s27 = scalar_lea.sflag [#allocation4], %s1908_s11 }
 0x2be   : > { %p2441_p0 = pnand %p2444_p3, %p2747_p8 }
 0x2c0   : > { %2585 = dma.done.wait (!%p2441_p0), %s1909_s27, 1024  }
 0x2c1   : > { %2587 = vsyncadd (!%p2441_p0), %s1909_s27, 4294966272  ;;  %s26_s26 = sadd.s32 1, %s3398_s12   ;;  %s3401_s18 = sld [smem:[#allocation7_spill]] }
 0x2c2   : > { %p23_p1 = scmp.ge.s32.totalorder %s26_s26, 6   ;;  %s3402_s21 = sld [smem:[#allocation14_spill]] }
 0x2c3   : > { %s3403_s22 = sld [smem:[#allocation8_spill]]  ;;  %s3404_s23 = sld [smem:[#allocation9_spill]] }
 0x2c4   : > { %s3405_s24 = sld [smem:[#allocation11_spill]]  ;;  %s3406_s25 = sld [smem:[#allocation12_spill]] }
 0x2c5   : > { %s3407_s19 = smov %s2594_s20  ;;  %25 = sbr.rel (!%p23_p1) target bundleno = 9 (0x9), region = 125 }
 0x2c7   : > { %s3408_s20 = smov %s3401_s18 }
 0x2cc   :  { %1927 = vsyncpa [#allocation4], 1 }
 0x2cd   :  { %1929 = vsyncpa [#allocation4 + $0x1], 1 }

</bundles_post_ra>
